<compile_context>
chip_gen: v6e
topology: v6e:2x2x1
jax: 0.10.0
libtpu: 0.0.40
codegen_flags: <defaults>
</compile_context>

<pallas_src>
import functools

import jax
import jax.numpy as jnp
from jax.experimental import pallas as pl
from jax.experimental.pallas import tpu as pltpu

_BN_EPS = 1e-5


def _round_up(x, m):
    return (x + m - 1) // m * m


def _pick_tile(n, cap, quantum):
    """Largest tile <= cap that divides n (full dim always allowed)."""
    if n <= cap:
        return n
    d = cap - cap % quantum
    while d >= quantum:
        if n % d == 0:
            return d
        d -= quantum
    return None


# ----------------------------------------------------------------------------
# Fused matmul + per-channel epilogue Pallas kernel (all convs and the fc)
# ----------------------------------------------------------------------------
def _make_fused_kernel(has_alpha, has_post, has_res):
    def kernel(*refs):
        a_ref, b_ref, s_ref, c_ref = refs[:4]
        idx = 4
        if has_alpha:
            al_ref = refs[idx]
            idx += 1
        if has_post:
            ps_ref, pb_ref = refs[idx], refs[idx + 1]
            idx += 2
        if has_res:
            r_ref, rs_ref = refs[idx], refs[idx + 1]
            idx += 2
        o_ref, acc_ref = refs[idx], refs[idx + 1]

        @pl.when(pl.program_id(2) == 0)
        def _():
            acc_ref[...] = jnp.zeros_like(acc_ref)

        acc_ref[...] += jnp.dot(a_ref[...], b_ref[...],
                                preferred_element_type=jnp.float32)

        @pl.when(pl.program_id(2) == pl.num_programs(2) - 1)
        def _():
            y = acc_ref[...] * s_ref[...] + c_ref[...]
            if has_alpha:                       # PReLU
                y = jnp.where(y > 0, y, al_ref[...] * y)
            if has_post:                        # second affine (stem only)
                y = y * ps_ref[...] + pb_ref[...]
            if has_res:                         # scaled residual add
                y = y + rs_ref[...] * r_ref[...].astype(jnp.float32)
            o_ref[...] = y.astype(o_ref.dtype)

    return kernel


def _fused_matmul(a, b, scale, bias, alpha=None, post_scale=None,
                  post_bias=None, residual=None, res_scale=None,
                  out_dtype=jnp.bfloat16):
    """epilogue(A @ B): affine -> [PReLU] -> [affine] -> [+ res_scale*residual]."""
    M, K = a.shape
    _, N = b.shape
    a = a.astype(jnp.bfloat16)
    b = b.astype(jnp.bfloat16)

    tm = _pick_tile(M, 512, 8) or 512
    tk = _pick_tile(K, 2048, 128) or 2048
    tn = _pick_tile(N, 512, 128) or 512
    Mp, Kp, Np = _round_up(M, tm), _round_up(K, tk), _round_up(N, tn)

    def pad2(x, rows, cols):
        return x if rows == 0 and cols == 0 else jnp.pad(x, ((0, rows), (0, cols)))

    def pvec(v):
        return pad2(v.reshape(1, N).astype(jnp.float32), 0, Np - N)

    a = pad2(a, Mp - M, Kp - K)
    b = pad2(b, Kp - K, Np - N)

    mat_a_spec = pl.BlockSpec((tm, tk), lambda i, j, k: (i, k))
    mat_b_spec = pl.BlockSpec((tk, tn), lambda i, j, k: (k, j))
    out_spec = pl.BlockSpec((tm, tn), lambda i, j, k: (i, j))
    vec_spec = pl.BlockSpec((1, tn), lambda i, j, k: (0, j))

    inputs = [a, b, pvec(scale), pvec(bias)]
    in_specs = [mat_a_spec, mat_b_spec, vec_spec, vec_spec]
    if alpha is not None:
        inputs.append(pvec(alpha))
        in_specs.append(vec_spec)
    if post_scale is not None:
        inputs += [pvec(post_scale), pvec(post_bias)]
        in_specs += [vec_spec, vec_spec]
    if residual is not None:
        inputs.append(pad2(residual.astype(jnp.bfloat16), Mp - M, Np - N))
        in_specs.append(out_spec)
        inputs.append(pvec(res_scale))
        in_specs.append(vec_spec)

    out = pl.pallas_call(
        _make_fused_kernel(alpha is not None, post_scale is not None,
                           residual is not None),
        out_shape=jax.ShapeDtypeStruct((Mp, Np), out_dtype),
        grid_spec=pltpu.PrefetchScalarGridSpec(
            num_scalar_prefetch=0,
            grid=(Mp // tm, Np // tn, Kp // tk),
            in_specs=in_specs,
            out_specs=out_spec,
            scratch_shapes=[pltpu.VMEM((tm, tn), jnp.float32)]),
        compiler_params=pltpu.CompilerParams(
            dimension_semantics=("parallel", "parallel", "arbitrary")),
    )(*inputs)
    if Mp != M or Np != N:
        out = out[:M, :N]
    return out


# ----------------------------------------------------------------------------
# Conv / fc wrappers (im2col + fused matmul; all epilogues ride the matmul)
# ----------------------------------------------------------------------------
@functools.partial(jax.jit, static_argnames=("stride",))
def conv3x3_fused(x, w_mat, *, stride, scale, bias, alpha=None, post_scale=None,
                  post_bias=None, residual=None, res_scale=None):
    # x: (N,H,W,Cin) bf16 ; w_mat: (9*Cin, Cout) bf16 in (kh, kw, cin) tap order.
    N, H, W, C = x.shape
    Cout = w_mat.shape[1]
    Ho = (H - 1) // stride + 1
    Wo = (W - 1) // stride + 1
    xp = jnp.pad(x, ((0, 0), (1, 1), (1, 1), (0, 0)))
    cols = [xp[:, i:i + stride * Ho:stride, j:j + stride * Wo:stride, :]
            for i in range(3) for j in range(3)]
    a = jnp.concatenate(cols, axis=-1).reshape(N * Ho * Wo, 9 * C)
    res2d = None if residual is None else residual.reshape(N * Ho * Wo, Cout)
    out = _fused_matmul(a, w_mat, scale, bias, alpha=alpha,
                        post_scale=post_scale, post_bias=post_bias,
                        residual=res2d, res_scale=res_scale)
    return out.reshape(N, Ho, Wo, Cout)


@functools.partial(jax.jit, static_argnames=("stride",))
def conv1x1_fused(x, w_mat, *, stride, scale, bias):
    xs = x[:, ::stride, ::stride, :]
    N, Ho, Wo, C = xs.shape
    out = _fused_matmul(xs.reshape(N * Ho * Wo, C), w_mat, scale, bias)
    return out.reshape(N, Ho, Wo, w_mat.shape[1])


@jax.jit
def fc_fused(x2d, w_mat, scale, bias):
    return _fused_matmul(x2d, w_mat, scale, bias, out_dtype=jnp.float32)


def interpolate_nearest_nchw(img, out_h, out_w):
    # F.interpolate(img, (112,112)) default mode='nearest': src = floor(dst*in/out)
    N, C, H, W = img.shape
    hi = (jnp.arange(out_h) * H) // out_h
    wi = (jnp.arange(out_w) * W) // out_w
    return img[:, :, hi][:, :, :, wi]


# ----------------------------------------------------------------------------
# iresnet50 parameters (deterministic synthetic init, PyTorch layouts)
# ----------------------------------------------------------------------------
def init_params(seed=0):
    keys = iter(jax.random.split(jax.random.PRNGKey(seed), 4096))

    def nk():
        return next(keys)

    def conv_w(cout, cin, k):
        std = (2.0 / (cin * k * k)) ** 0.5
        return std * jax.random.normal(nk(), (cout, cin, k, k), jnp.float32)

    def bn_p(c):
        return dict(
            gamma=1.0 + 0.05 * jax.random.normal(nk(), (c,), jnp.float32),
            beta=0.05 * jax.random.normal(nk(), (c,), jnp.float32),
            mean=0.05 * jax.random.normal(nk(), (c,), jnp.float32),
            var=1.0 + 0.05 * jnp.abs(jax.random.normal(nk(), (c,), jnp.float32)),
        )

    def prelu_p(c):
        return jnp.full((c,), 0.25, jnp.float32)

    params = dict(conv1=conv_w(64, 3, 3), bn1=bn_p(64), prelu=prelu_p(64))

    layers_cfg = [(64, 3), (128, 4), (256, 14), (512, 3)]  # iresnet50
    inplanes = 64
    layers = []
    for planes, nblocks in layers_cfg:
        blocks = []
        for bi in range(nblocks):
            stride = 2 if bi == 0 else 1
            blk = dict(
                stride=stride,
                bn1=bn_p(inplanes),
                conv1=conv_w(planes, inplanes, 3),
                bn2=bn_p(planes),
                prelu=prelu_p(planes),
                conv2=conv_w(planes, planes, 3),
                bn3=bn_p(planes),
            )
            if stride != 1 or inplanes != planes:
                blk["down_conv"] = conv_w(planes, inplanes, 1)
                blk["down_bn"] = bn_p(planes)
            blocks.append(blk)
            inplanes = planes
        layers.append(blocks)
    params["layers"] = layers
    params["bn2"] = bn_p(512)

    fc_in = 512 * 7 * 7
    params["fc_w"] = (1.0 / fc_in ** 0.5) * jax.random.normal(
        nk(), (512, fc_in), jnp.float32)
    params["fc_b"] = 0.01 * jax.random.normal(nk(), (512,), jnp.float32)
    params["features"] = dict(  # BatchNorm1d
        gamma=jnp.ones((512,), jnp.float32),
        beta=0.05 * jax.random.normal(nk(), (512,), jnp.float32),
        mean=0.05 * jax.random.normal(nk(), (512,), jnp.float32),
        var=1.0 + 0.05 * jnp.abs(jax.random.normal(nk(), (512,), jnp.float32)),
    )
    return params


# ----------------------------------------------------------------------------
# Param preparation: fold every eval-mode BN / bias into matmul epilogues
# ----------------------------------------------------------------------------
def _bn_sb(bn):
    s = bn["gamma"] * jax.lax.rsqrt(bn["var"] + _BN_EPS)
    return s, bn["beta"] - bn["mean"] * s


def _conv_mat(w):
    # PyTorch (Cout,Cin,kh,kw) -> (kh*kw*Cin, Cout) bf16, matching im2col order.
    cout, cin, kh, kw = w.shape
    return jnp.transpose(w, (2, 3, 1, 0)).reshape(kh * kw * cin, cout).astype(
        jnp.bfloat16)


def prepare_params(p):
    """Each block's bn1 is composed into the producing conv's epilogue; the
    identity / downsample path is compensated exactly (per-channel algebra)."""
    blocks = [blk for layer in p["layers"] for blk in layer]
    prep_blocks = []
    for bi, blk in enumerate(blocks):
        if bi + 1 < len(blocks):
            ns, nb = _bn_sb(blocks[bi + 1]["bn1"])   # next block's bn1
        else:
            ns, nb = _bn_sb(p["bn2"])                # final BatchNorm2d
        cs, cb = _bn_sb(blk["bn1"])                  # this block's bn1 (applied upstream)
        s2, b2 = _bn_sb(blk["bn2"])
        s3, b3 = _bn_sb(blk["bn3"])
        q = dict(stride=blk["stride"],
                 w1=_conv_mat(blk["conv1"]), c1_s=s2, c1_b=b2, alpha=blk["prelu"],
                 w2=_conv_mat(blk["conv2"]))
        if "down_conv" in blk:
            sd, bd = _bn_sb(blk["down_bn"])
            wd = blk["down_conv"][:, :, 0, 0] / cs[None, :]   # undo upstream bn1 scale
            q["wd"] = jnp.transpose(wd).astype(jnp.bfloat16)  # (Cin, Cout)
            q["d_s"] = sd
            q["d_b"] = bd - sd * (wd @ cb)                    # undo upstream bn1 bias
            q["c2_s"] = ns * s3
            q["c2_b"] = ns * b3 + nb
            q["c2_rs"] = ns
        else:
            q["c2_s"] = ns * s3
            q["c2_b"] = ns * b3 + nb - ns * cb / cs
            q["c2_rs"] = ns / cs
        prep_blocks.append(q)

    s0, b0 = _bn_sb(p["bn1"])            # stem bn
    fs, fb = _bn_sb(blocks[0]["bn1"])    # first block's bn1, folded into stem epilogue
    ffs, ffb = _bn_sb(p["features"])     # final BatchNorm1d
    return dict(
        stem_w=_conv_mat(p["conv1"]), stem_s=s0, stem_b=b0,
        stem_alpha=p["prelu"], stem_ps=fs, stem_pb=fb,
        blocks=prep_blocks,
        fc_w=jnp.transpose(p["fc_w"]).astype(jnp.bfloat16),   # (fc_in, 512)
        fc_s=ffs, fc_b=ffs * p["fc_b"] + ffb,
    )


# ----------------------------------------------------------------------------
# Forward pass
# ----------------------------------------------------------------------------
def block_forward(y, q):
    # y == bn1(x) for this block; all BN/PReLU/add math lives in conv epilogues.
    t = conv3x3_fused(y, q["w1"], stride=1,
                      scale=q["c1_s"], bias=q["c1_b"], alpha=q["alpha"])
    if "wd" in q:
        res = conv1x1_fused(y, q["wd"], stride=q["stride"],
                            scale=q["d_s"], bias=q["d_b"])
    else:
        res = y
    return conv3x3_fused(t, q["w2"], stride=q["stride"],
                         scale=q["c2_s"], bias=q["c2_b"],
                         residual=res, res_scale=q["c2_rs"])


def face_emb_forward(prep, img_nchw):
    x = interpolate_nearest_nchw(img_nchw.astype(jnp.float32), 112, 112)
    x = jnp.transpose(x, (0, 2, 3, 1)).astype(jnp.bfloat16)        # NCHW -> NHWC
    # stem conv epilogue: bn1 -> PReLU -> (first block's bn1), all fused.
    y = conv3x3_fused(x, prep["stem_w"], stride=1,
                      scale=prep["stem_s"], bias=prep["stem_b"],
                      alpha=prep["stem_alpha"],
                      post_scale=prep["stem_ps"], post_bias=prep["stem_pb"])
    for q in prep["blocks"]:
        y = block_forward(y, q)
    # y already includes the final BatchNorm2d; flatten in torch (C,H,W) order.
    flat = jnp.transpose(y, (0, 3, 1, 2)).reshape(y.shape[0], -1)
    # dropout: eval mode -> identity.  fc epilogue folds fc bias + BatchNorm1d.
    return fc_fused(flat, prep["fc_w"], prep["fc_s"], prep["fc_b"])


if __name__ == "__main__":
    # TODO(synk): weights are synthesized deterministically instead of
    # torch.load(weight) from a checkpoint file.
    params = init_params(seed=0)
    prep = prepare_params(params)
    img = jax.random.normal(jax.random.PRNGKey(0), (2, 3, 16, 16), jnp.float32)
    emb = face_emb_forward(prep, img)
    emb = jax.block_until_ready(emb)
    assert emb.shape == (2, 512), emb.shape
    assert bool(jnp.all(jnp.isfinite(emb)))
    print("KERNEL_OK")
</pallas_src>

<mosaic_0001>
module attributes {stable_mosaic.version = 11 : i64} {
  func.func @kernel(%arg0: i32, %arg1: i32, %arg2: i32, %arg3: memref<512x27xbf16, #tpu.memory_space<vmem>>, %arg4: memref<27x64xbf16, #tpu.memory_space<vmem>>, %arg5: memref<1x64xf32, #tpu.memory_space<vmem>>, %arg6: memref<1x64xf32, #tpu.memory_space<vmem>>, %arg7: memref<1x64xf32, #tpu.memory_space<vmem>>, %arg8: memref<1x64xf32, #tpu.memory_space<vmem>>, %arg9: memref<1x64xf32, #tpu.memory_space<vmem>>, %arg10: memref<512x64xbf16, #tpu.memory_space<vmem>>, %arg11: memref<512x64xf32, #tpu.memory_space<vmem>>) attributes {dimension_semantics = [#tpu.dimension_semantics<parallel>, #tpu.dimension_semantics<parallel>, #tpu.dimension_semantics<arbitrary>], iteration_bounds = array<i64: 49, 1, 1>, scalar_prefetch = 0 : i64, scratch_operands = 1 : i64, tpu.core_type = #tpu.core_type<tc>, window_params = [{transform_indices = @transform_0, window_bounds = array<i64: 512, 27>}, {transform_indices = @transform_1, window_bounds = array<i64: 27, 64>}, {transform_indices = @transform_2, window_bounds = array<i64: 1, 64>}, {transform_indices = @transform_3, window_bounds = array<i64: 1, 64>}, {transform_indices = @transform_4, window_bounds = array<i64: 1, 64>}, {transform_indices = @transform_5, window_bounds = array<i64: 1, 64>}, {transform_indices = @transform_6, window_bounds = array<i64: 1, 64>}, {transform_indices = @transform_7, window_bounds = array<i64: 512, 64>}]} {
    %c0_i32 = arith.constant 0 : i32
    %0 = arith.cmpi eq, %arg2, %c0_i32 : i32
    %1 = arith.extui %0 : i1 to i32
    %c0_i32_0 = arith.constant 0 : i32
    %2 = arith.cmpi ne, %1, %c0_i32_0 : i32
    scf.if %2 {
      %cst_10 = arith.constant 0.000000e+00 : f32
      %12 = vector.broadcast %cst_10 : f32 to vector<512x64xf32>
      %c0_11 = arith.constant 0 : index
      %c0_12 = arith.constant 0 : index
      %13 = vector.load %arg11[%c0_11, %c0_12] : memref<512x64xf32, #tpu.memory_space<vmem>>, vector<512x64xf32>
      tpu.vector_store %arg11[%c0_11, %c0_12], %12 {strides = array<i32>} : memref<512x64xf32, #tpu.memory_space<vmem>>, vector<512x64xf32>,
    } else {
    }
    %c0 = arith.constant 0 : index
    %c0_1 = arith.constant 0 : index
    %3 = vector.load %arg11[%c0, %c0_1] : memref<512x64xf32, #tpu.memory_space<vmem>>, vector<512x64xf32>
    %c0_2 = arith.constant 0 : index
    %c0_3 = arith.constant 0 : index
    %4 = vector.load %arg3[%c0_2, %c0_3] : memref<512x27xbf16, #tpu.memory_space<vmem>>, vector<512x27xbf16>
    %c0_4 = arith.constant 0 : index
    %c0_5 = arith.constant 0 : index
    %5 = vector.load %arg4[%c0_4, %c0_5] : memref<27x64xbf16, #tpu.memory_space<vmem>>, vector<27x64xbf16>
    %cst = arith.constant dense<0.000000e+00> : vector<512x64xf32>
    %6 = tpu.matmul %4, %5, %cst {dimension_numbers = #tpu.dot_dimension_numbers<[1], [0], [0], [1], [0, 0, 1, 1], [], []>} : vector<512x27xbf16>, vector<27x64xbf16>, vector<512x64xf32> -> vector<512x64xf32>
    %7 = arith.addf %3, %6 : vector<512x64xf32>
    %c0_6 = arith.constant 0 : index
    %c0_7 = arith.constant 0 : index
    %8 = vector.load %arg11[%c0_6, %c0_7] : memref<512x64xf32, #tpu.memory_space<vmem>>, vector<512x64xf32>
    tpu.vector_store %arg11[%c0_6, %c0_7], %7 {strides = array<i32>} : memref<512x64xf32, #tpu.memory_space<vmem>>, vector<512x64xf32>,
    %c0_i32_8 = arith.constant 0 : i32
    %9 = arith.cmpi eq, %arg2, %c0_i32_8 : i32
    %10 = arith.extui %9 : i1 to i32
    %c0_i32_9 = arith.constant 0 : i32
    %11 = arith.cmpi ne, %10, %c0_i32_9 : i32
    scf.if %11 {
      %c0_10 = arith.constant 0 : index
      %c0_11 = arith.constant 0 : index
      %12 = vector.load %arg11[%c0_10, %c0_11] : memref<512x64xf32, #tpu.memory_space<vmem>>, vector<512x64xf32>
      %c0_12 = arith.constant 0 : index
      %c0_13 = arith.constant 0 : index
      %13 = vector.load %arg5[%c0_12, %c0_13] : memref<1x64xf32, #tpu.memory_space<vmem>>, vector<1x64xf32>
      %14 = vector.broadcast %13 : vector<1x64xf32> to vector<512x64xf32>
      %15 = arith.mulf %12, %14 : vector<512x64xf32>
      %c0_14 = arith.constant 0 : index
      %c0_15 = arith.constant 0 : index
      %16 = vector.load %arg6[%c0_14, %c0_15] : memref<1x64xf32, #tpu.memory_space<vmem>>, vector<1x64xf32>
      %17 = vector.broadcast %16 : vector<1x64xf32> to vector<512x64xf32>
      %18 = arith.addf %15, %17 : vector<512x64xf32>
      %cst_16 = arith.constant 0.000000e+00 : f32
      %19 = vector.broadcast %cst_16 : f32 to vector<512x64xf32>
      %20 = arith.cmpf ogt, %18, %19 : vector<512x64xf32>
      %c0_17 = arith.constant 0 : index
      %c0_18 = arith.constant 0 : index
      %21 = vector.load %arg7[%c0_17, %c0_18] : memref<1x64xf32, #tpu.memory_space<vmem>>, vector<1x64xf32>
      %22 = vector.broadcast %21 : vector<1x64xf32> to vector<512x64xf32>
      %23 = arith.mulf %22, %18 : vector<512x64xf32>
      %24 = arith.select %20, %18, %23 : vector<512x64xi1>, vector<512x64xf32>
      %c0_19 = arith.constant 0 : index
      %c0_20 = arith.constant 0 : index
      %25 = vector.load %arg8[%c0_19, %c0_20] : memref<1x64xf32, #tpu.memory_space<vmem>>, vector<1x64xf32>
      %26 = vector.broadcast %25 : vector<1x64xf32> to vector<512x64xf32>
      %27 = arith.mulf %24, %26 : vector<512x64xf32>
      %c0_21 = arith.constant 0 : index
      %c0_22 = arith.constant 0 : index
      %28 = vector.load %arg9[%c0_21, %c0_22] : memref<1x64xf32, #tpu.memory_space<vmem>>, vector<1x64xf32>
      %29 = vector.broadcast %28 : vector<1x64xf32> to vector<512x64xf32>
      %30 = arith.addf %27, %29 : vector<512x64xf32>
      %31 = arith.truncf %30 : vector<512x64xf32> to vector<512x64xbf16>
      %c0_23 = arith.constant 0 : index
      %c0_24 = arith.constant 0 : index
      %32 = vector.load %arg10[%c0_23, %c0_24] : memref<512x64xbf16, #tpu.memory_space<vmem>>, vector<512x64xbf16>
      tpu.vector_store %arg10[%c0_23, %c0_24], %31 {strides = array<i32>} : memref<512x64xbf16, #tpu.memory_space<vmem>>, vector<512x64xbf16>,
    } else {
    }
    return
  }
  func.func @transform_0(%arg0: i32, %arg1: i32, %arg2: i32) -> (i32, i32) {
    %c0_i32 = arith.constant 0 : i32
    return %arg0, %arg2 : i32, i32
  }
  func.func @transform_1(%arg0: i32, %arg1: i32, %arg2: i32) -> (i32, i32) {
    %c0_i32 = arith.constant 0 : i32
    return %arg2, %arg1 : i32, i32
  }
  func.func @transform_2(%arg0: i32, %arg1: i32, %arg2: i32) -> (i32, i32) {
    %c0_i32 = arith.constant 0 : i32
    %c0_i32_0 = arith.constant 0 : i32
    return %c0_i32, %arg1 : i32, i32
  }
  func.func @transform_3(%arg0: i32, %arg1: i32, %arg2: i32) -> (i32, i32) {
    %c0_i32 = arith.constant 0 : i32
    %c0_i32_0 = arith.constant 0 : i32
    return %c0_i32, %arg1 : i32, i32
  }
  func.func @transform_4(%arg0: i32, %arg1: i32, %arg2: i32) -> (i32, i32) {
    %c0_i32 = arith.constant 0 : i32
    %c0_i32_0 = arith.constant 0 : i32
    return %c0_i32, %arg1 : i32, i32
  }
  func.func @transform_5(%arg0: i32, %arg1: i32, %arg2: i32) -> (i32, i32) {
    %c0_i32 = arith.constant 0 : i32
    %c0_i32_0 = arith.constant 0 : i32
    return %c0_i32, %arg1 : i32, i32
  }
  func.func @transform_6(%arg0: i32, %arg1: i32, %arg2: i32) -> (i32, i32) {
    %c0_i32 = arith.constant 0 : i32
    %c0_i32_0 = arith.constant 0 : i32
    return %c0_i32, %arg1 : i32, i32
  }
  func.func @transform_7(%arg0: i32, %arg1: i32, %arg2: i32) -> (i32, i32) {
    %c0_i32 = arith.constant 0 : i32
    return %arg0, %arg1 : i32, i32
  }
}

</mosaic_0001>

<bundles_post_ra>
// kernel: conv3x3_fused.1
= control target key start
LH: loop header
LB: loop body
LE: loop exit
PB: predicated region body
PF: predicated region fallthrough
CT: control target
= control target key end

     0   :  { %s2801_s24 = smov 0   ;;  %s2803_s25 = smov 0   ;;  %s3762_s0 = inlined_call_operand.vmem [shape: bf16[25088,27], index: 0, kind: input, shape index: {}]   ;;  %s3763_s1 = inlined_call_operand.vmem [shape: bf16[27,64], index: 1, kind: input, shape index: {}]   ;;  %s3764_s2 = inlined_call_operand.vmem [shape: f32[1,64], index: 2, kind: input, shape index: {}]   ;;  %s3765_s3 = inlined_call_operand.vmem [shape: f32[1,64], index: 3, kind: input, shape index: {}]   ;;  %s3766_s4 = inlined_call_operand.vmem [shape: f32[1,64], index: 4, kind: input, shape index: {}]   ;;  %s3767_s5 = inlined_call_operand.vmem [shape: f32[1,64], index: 5, kind: input, shape index: {}]   ;;  %s3768_s6 = inlined_call_operand.vmem [shape: f32[1,64], index: 6, kind: input, shape index: {}]   ;;  %s3769_s7 = inlined_call_operand.vmem [shape: bf16[25088,64], index: 7, kind: output, shape index: {}]  }
   0x1   :  { %s2805_s26 = smov 0  }
   0x2 LB: > { %s36_s27 = sadd.s32 1, %s2753_s25  ;;  %p2358_p0 = scmp.ge.s32.totalorder %s2757_s26, 1  ;;  %s2757_s26 = sphi %s2805_s26, %s17_s26   ;;  %s2753_s25 = sphi %s2803_s25, %s3772_s25   ;;  %s2749_s24 = sphi %s2801_s24, %s3771_s24  }
   0x3   : > { %p38_p1 = scmp.ge.s32.totalorder %s36_s27, 49  ;;  %p320_p2 = scmp.lt.s32.totalorder %s2757_s26, 50 }
   0x5   : > { %s3774_s27 = smov (%p38_p1, %s36_s27), 0  ;;  %p321_p3 = pnand %p2358_p0, %p320_p2 }
   0x6   : > { %s2359_s30 = sshll.u32 (!%p321_p3), %s2749_s24, 6 }
   0x7   : > { %324 = sbr.rel (%p321_p3) target bundleno = 384 (0x180), region = 48  ;;  %p2827_p4 = scmp.lt.s32.totalorder (!%p321_p3), %s2359_s30, 3135 }
   0xc   : > { %v2696_v0 = vld [vmem:[%s3763_s1 + $0x8] sm:$0x3f]   ;;  %vm893_vm0 = vcmask 1044480   ;;  %vm894_vm1 = vcmask 1045504   ;;  %v2759_v1 = vmov 65535   ;;  %vm428_vm2 = vcmask 523264  }
   0xd   : > { %v895_v2 = vsel %vm893_vm0, 4294967295, %v2759_v1  ;;  %v2836_v5 = vld [vmem:[%s3763_s1] sm:$0xff]   ;;  %v2760_v6 = vmov 0.0   ;;  %s3776_s30 = smov (!%p2827_p4, %s2359_s30), 3135  ;;  %vm796_vm3 = vcmask 220160   ;;  %vm2124_vm4 = vcmask 519168  }
   0xe   : > { %v896_v3 = vsel %vm894_vm1, %v895_v2, 0  ;;  %431 = vst.msk [vmem:[#allocation2 + $0x10] sm:$0xff] %vm428_vm2, %v2760_v6  ;;  %429 = vst.msk [vmem:[#allocation2] sm:$0xff] %vm428_vm2, %v2760_v6  ;;  %s2360_s11 = sshll.u32 %s3776_s30, 2  ;;  %v3061_v1 = vld [vmem:[%s3764_s2] ss:$0 sm:$0xff] }
   0xf   : > { %v2831_v4 = vand.u32 %v2696_v0, %v896_v3  ;;  %430 = vst.msk [vmem:[#allocation2 + $0x8] sm:$0xff] %vm428_vm2, %v2760_v6  ;;  %432 = vst.msk [vmem:[#allocation2 + $0x18] sm:$0xff] %vm428_vm2, %v2760_v6  ;;  %s2984_s14 = scalar_lea.vmem %s3762_s0, %s2360_s11  ;;  %s3135_s8 = scalar_lea.vmem %s3769_s7, %s2360_s11 }
  0x10   : > { %433 = vst.msk [vmem:[#allocation2 + $0x20] sm:$0xff] %vm428_vm2, %v2760_v6  ;;  %434 = vst.msk [vmem:[#allocation2 + $0x28] sm:$0xff] %vm428_vm2, %v2760_v6  ;;  %v2698_v7 = vld [vmem:[%s2984_s14] sm:$0xff]   ;;  %v2700_v9 = vld [vmem:[%s2984_s14 + $0x8] sm:$0xff]  }
  0x11   : > { %435 = vst.msk [vmem:[#allocation2 + $0x30] sm:$0xff] %vm428_vm2, %v2760_v6  ;;  %436 = vst.msk [vmem:[#allocation2 + $0x38] sm:$0xff] %vm428_vm2, %v2760_v6  ;;  %2598 = vmatprep.subr.bf16.mxu0 %v2831_v4  ;;  %2666 = vmatprep.subr.bf16.mxu1 %v2831_v4  ;;  %v2699_v8 = vld [vmem:[%s2984_s14 + $0x80] sm:$0xff]   ;;  %v2701_v10 = vld [vmem:[%s2984_s14 + $0x88] sm:$0xff]  }
  0x12   : > { %437 = vst.msk [vmem:[#allocation2 + $0x40] sm:$0xff] %vm428_vm2, %v2760_v6  ;;  %438 = vst.msk [vmem:[#allocation2 + $0x48] sm:$0xff] %vm428_vm2, %v2760_v6  ;;  %2599 = vmatpush3.bf16.msra.mxu0 %v2831_v4  ;;  %2668 = vmatpush3.bf16.msra.mxu1 %v2831_v4  ;;  %v2702_v11 = vld [vmem:[%s2984_s14 + $0x10] sm:$0xff]   ;;  %v2704_v13 = vld [vmem:[%s2984_s14 + $0x18] sm:$0xff]  }
  0x13   : > { %439 = vst.msk [vmem:[#allocation2 + $0x50] sm:$0xff] %vm428_vm2, %v2760_v6  ;;  %440 = vst.msk [vmem:[#allocation2 + $0x58] sm:$0xff] %vm428_vm2, %v2760_v6  ;;  %2600 = vmatprep.subr.bf16.mxu0 %v2836_v5  ;;  %2667 = vmatprep.subr.bf16.mxu1 %v2836_v5  ;;  %v2703_v12 = vld [vmem:[%s2984_s14 + $0x90] sm:$0xff]   ;;  %v2705_v14 = vld [vmem:[%s2984_s14 + $0x98] sm:$0xff]  }
  0x14   : > { %441 = vst.msk [vmem:[#allocation2 + $0x60] sm:$0xff] %vm428_vm2, %v2760_v6  ;;  %442 = vst.msk [vmem:[#allocation2 + $0x68] sm:$0xff] %vm428_vm2, %v2760_v6  ;;  %2602 = vmatprep.mubr.msk.bf16.mxu0 %vm796_vm3, %v2698_v7  ;;  %2634 = vmatprep.mubr.msk.bf16.mxu1 %vm796_vm3, %v2699_v8  ;;  %v2706_v15 = vld [vmem:[%s2984_s14 + $0x20] sm:$0xff]   ;;  %v2708_v17 = vld [vmem:[%s2984_s14 + $0x28] sm:$0xff]  }
  0x15   : > { %443 = vst.msk [vmem:[#allocation2 + $0x70] sm:$0xff] %vm428_vm2, %v2760_v6  ;;  %444 = vst.msk [vmem:[#allocation2 + $0x78] sm:$0xff] %vm428_vm2, %v2760_v6  ;;  %v2707_v16 = vld [vmem:[%s2984_s14 + $0xa0] sm:$0xff]   ;;  %v2709_v18 = vld [vmem:[%s2984_s14 + $0xa8] sm:$0xff]  }
  0x16   : > { %445 = vst.msk [vmem:[#allocation2 + $0x80] sm:$0xff] %vm428_vm2, %v2760_v6  ;;  %446 = vst.msk [vmem:[#allocation2 + $0x88] sm:$0xff] %vm428_vm2, %v2760_v6  ;;  %2601 = vmatpush3.bf16.msra.mxu0 %v2836_v5  ;;  %2669 = vmatpush3.bf16.msra.mxu1 %v2836_v5  ;;  %v2710_v19 = vld [vmem:[%s2984_s14 + $0x30] sm:$0xff]   ;;  %v2712_v21 = vld [vmem:[%s2984_s14 + $0x38] sm:$0xff]  }
  0x17   : > { %447 = vst.msk [vmem:[#allocation2 + $0x90] sm:$0xff] %vm428_vm2, %v2760_v6  ;;  %448 = vst.msk [vmem:[#allocation2 + $0x98] sm:$0xff] %vm428_vm2, %v2760_v6  ;;  %v2711_v20 = vld [vmem:[%s2984_s14 + $0xb0] sm:$0xff]   ;;  %v2713_v22 = vld [vmem:[%s2984_s14 + $0xb8] sm:$0xff]  }
  0x18   : > { %449 = vst.msk [vmem:[#allocation2 + $0xa0] sm:$0xff] %vm428_vm2, %v2760_v6  ;;  %450 = vst.msk [vmem:[#allocation2 + $0xa8] sm:$0xff] %vm428_vm2, %v2760_v6  ;;  %v2714_v23 = vld [vmem:[%s2984_s14 + $0x40] sm:$0xff]   ;;  %v2716_v25 = vld [vmem:[%s2984_s14 + $0x48] sm:$0xff]  }
  0x19   : > { %451 = vst.msk [vmem:[#allocation2 + $0xb0] sm:$0xff] %vm428_vm2, %v2760_v6  ;;  %452 = vst.msk [vmem:[#allocation2 + $0xb8] sm:$0xff] %vm428_vm2, %v2760_v6  ;;  %2603 = vmatmul.mubr.msk.bf16.vlgmr.msra.gmra.mxu0 %vm796_vm3, %v2700_v9  ;;  %2635 = vmatmul.mubr.msk.bf16.vlgmr.msra.gmra.mxu1 %vm796_vm3, %v2701_v10  ;;  %v2715_v24 = vld [vmem:[%s2984_s14 + $0xc0] sm:$0xff]   ;;  %v2717_v26 = vld [vmem:[%s2984_s14 + $0xc8] sm:$0xff]  }
  0x1a   : > { %453 = vst.msk [vmem:[#allocation2 + $0xc0] sm:$0xff] %vm428_vm2, %v2760_v6  ;;  %454 = vst.msk [vmem:[#allocation2 + $0xc8] sm:$0xff] %vm428_vm2, %v2760_v6  ;;  %2606 = vmatprep.mubr.msk.bf16.mxu0 %vm796_vm3, %v2702_v11  ;;  %2638 = vmatprep.mubr.msk.bf16.mxu1 %vm796_vm3, %v2703_v12  ;;  %v2718_v27 = vld [vmem:[%s2984_s14 + $0x50] sm:$0xff]   ;;  %v2720_v29 = vld [vmem:[%s2984_s14 + $0x58] sm:$0xff]  }
  0x1b   : > { %455 = vst.msk [vmem:[#allocation2 + $0xd0] sm:$0xff] %vm428_vm2, %v2760_v6  ;;  %456 = vst.msk [vmem:[#allocation2 + $0xd8] sm:$0xff] %vm428_vm2, %v2760_v6  ;;  %v2719_v28 = vld [vmem:[%s2984_s14 + $0xd0] sm:$0xff]   ;;  %v2721_v30 = vld [vmem:[%s2984_s14 + $0xd8] sm:$0xff]  }
  0x1c   : > { %457 = vst.msk [vmem:[#allocation2 + $0xe0] sm:$0xff] %vm428_vm2, %v2760_v6  ;;  %458 = vst.msk [vmem:[#allocation2 + $0xe8] sm:$0xff] %vm428_vm2, %v2760_v6  ;;  %v2722_v31 = vld [vmem:[%s2984_s14 + $0x60] sm:$0xff]   ;;  %v2724_v33 = vld [vmem:[%s2984_s14 + $0x68] sm:$0xff]  }
  0x1d   : > { %459 = vst.msk [vmem:[#allocation2 + $0xf0] sm:$0xff] %vm428_vm2, %v2760_v6  ;;  %460 = vst.msk [vmem:[#allocation2 + $0xf8] sm:$0xff] %vm428_vm2, %v2760_v6  ;;  %v2723_v32 = vld [vmem:[%s2984_s14 + $0xe0] sm:$0xff]   ;;  %v2725_v34 = vld [vmem:[%s2984_s14 + $0xe8] sm:$0xff]  }
  0x1e   : > { %461 = vst.msk [vmem:[#allocation2 + $0x100] sm:$0xff] %vm428_vm2, %v2760_v6  ;;  %462 = vst.msk [vmem:[#allocation2 + $0x108] sm:$0xff] %vm428_vm2, %v2760_v6  ;;  %v2726_v35 = vld [vmem:[%s2984_s14 + $0x70] sm:$0xff]   ;;  %v2728_v37 = vld [vmem:[%s2984_s14 + $0x78] sm:$0xff]  }
  0x1f   : > { %463 = vst.msk [vmem:[#allocation2 + $0x110] sm:$0xff] %vm428_vm2, %v2760_v6  ;;  %464 = vst.msk [vmem:[#allocation2 + $0x118] sm:$0xff] %vm428_vm2, %v2760_v6  ;;  %v2727_v36 = vld [vmem:[%s2984_s14 + $0xf0] sm:$0xff]   ;;  %v2729_v38 = vld [vmem:[%s2984_s14 + $0xf8] sm:$0xff]  }
  0x20   : > { %465 = vst.msk [vmem:[#allocation2 + $0x120] sm:$0xff] %vm428_vm2, %v2760_v6  ;;  %466 = vst.msk [vmem:[#allocation2 + $0x128] sm:$0xff] %vm428_vm2, %v2760_v6  ;;  %v495_v39 = vld [vmem:[#allocation2 + $0x10] sm:$0xff]  ;;  %v493_v43 = vld [vmem:[#allocation2] sm:$0xff] }
  0x21   : > { %467 = vst.msk [vmem:[#allocation2 + $0x130] sm:$0xff] %vm428_vm2, %v2760_v6  ;;  %468 = vst.msk [vmem:[#allocation2 + $0x138] sm:$0xff] %vm428_vm2, %v2760_v6  ;;  %2607 = vmatmul.mubr.msk.bf16.gmra.mxu0 %vm796_vm3, %v2704_v13  ;;  %2639 = vmatmul.mubr.msk.bf16.gmra.mxu1 %vm796_vm3, %v2705_v14  ;;  %v496_v49 = vld [vmem:[#allocation2 + $0x18] sm:$0xff]  ;;  %v494_v55 = vld [vmem:[#allocation2 + $0x8] sm:$0xff] }
  0x22   : > { %469 = vst.msk [vmem:[#allocation2 + $0x140] sm:$0xff] %vm428_vm2, %v2760_v6  ;;  %470 = vst.msk [vmem:[#allocation2 + $0x148] sm:$0xff] %vm428_vm2, %v2760_v6  ;;  %2610 = vmatprep.mubr.msk.bf16.mxu0 %vm796_vm3, %v2706_v15  ;;  %2642 = vmatprep.mubr.msk.bf16.mxu1 %vm796_vm3, %v2707_v16  ;;  %v499_v61 = vld [vmem:[#allocation2 + $0x30] sm:$0xff]  ;;  %v497_v4 = vld [vmem:[#allocation2 + $0x20] sm:$0xff] }
  0x23   : > { %471 = vst.msk [vmem:[#allocation2 + $0x150] sm:$0xff] %vm428_vm2, %v2760_v6  ;;  %472 = vst.msk [vmem:[#allocation2 + $0x158] sm:$0xff] %vm428_vm2, %v2760_v6  ;;  %v3068_v9 = vld [vmem:[%s3765_s3] ss:$0 sm:$0xff] }
  0x24   : > { %473 = vst.msk [vmem:[#allocation2 + $0x160] sm:$0xff] %vm428_vm2, %v2760_v6  ;;  %474 = vst.msk [vmem:[#allocation2 + $0x168] sm:$0xff] %vm428_vm2, %v2760_v6 }
  0x25   : > { %475 = vst.msk [vmem:[#allocation2 + $0x170] sm:$0xff] %vm428_vm2, %v2760_v6  ;;  %476 = vst.msk [vmem:[#allocation2 + $0x178] sm:$0xff] %vm428_vm2, %v2760_v6  ;;  %v525_v44 = vld [vmem:[#allocation2 + $0x100] sm:$0xff]  ;;  %v526_v56 = vld [vmem:[#allocation2 + $0x108] sm:$0xff] }
  0x26   : > { %477 = vst.msk [vmem:[#allocation2 + $0x180] sm:$0xff] %vm428_vm2, %v2760_v6  ;;  %478 = vst.msk [vmem:[#allocation2 + $0x188] sm:$0xff] %vm428_vm2, %v2760_v6  ;;  %v527_v40 = vld [vmem:[#allocation2 + $0x110] sm:$0xff]  ;;  %v528_v50 = vld [vmem:[#allocation2 + $0x118] sm:$0xff] }
  0x27   : > { %479 = vst.msk [vmem:[#allocation2 + $0x190] sm:$0xff] %vm428_vm2, %v2760_v6  ;;  %480 = vst.msk [vmem:[#allocation2 + $0x198] sm:$0xff] %vm428_vm2, %v2760_v6  ;;  %v529_v5 = vld [vmem:[#allocation2 + $0x120] sm:$0xff] }
  0x28   : > { %481 = vst.msk [vmem:[#allocation2 + $0x1a0] sm:$0xff] %vm428_vm2, %v2760_v6  ;;  %482 = vst.msk [vmem:[#allocation2 + $0x1a8] sm:$0xff] %vm428_vm2, %v2760_v6  ;;  %v531_v62 = vld [vmem:[#allocation2 + $0x130] sm:$0xff] }
  0x29   : > { %483 = vst.msk [vmem:[#allocation2 + $0x1b0] sm:$0xff] %vm428_vm2, %v2760_v6  ;;  %484 = vst.msk [vmem:[#allocation2 + $0x1b8] sm:$0xff] %vm428_vm2, %v2760_v6  ;;  %2611 = vmatmul.mubr.msk.bf16.gmra.mxu0 %vm796_vm3, %v2708_v17  ;;  %2643 = vmatmul.mubr.msk.bf16.gmra.mxu1 %vm796_vm3, %v2709_v18  ;;  %v500_v17 = vld [vmem:[#allocation2 + $0x38] sm:$0xff] }
  0x2a   : > { %485 = vst.msk [vmem:[#allocation2 + $0x1c0] sm:$0xff] %vm428_vm2, %v2760_v6  ;;  %486 = vst.msk [vmem:[#allocation2 + $0x1c8] sm:$0xff] %vm428_vm2, %v2760_v6  ;;  %2614 = vmatprep.mubr.msk.bf16.mxu0 %vm796_vm3, %v2710_v19  ;;  %2646 = vmatprep.mubr.msk.bf16.mxu1 %vm796_vm3, %v2711_v20  ;;  %v532_v18 = vld [vmem:[#allocation2 + $0x138] sm:$0xff]  ;;  %v3077_v19 = vld [vmem:[%s3766_s4] ss:$0 sm:$0xff] }
  0x2b   : > { %487 = vst.msk [vmem:[#allocation2 + $0x1d0] sm:$0xff] %vm428_vm2, %v2760_v6  ;;  %488 = vst.msk [vmem:[#allocation2 + $0x1d8] sm:$0xff] %vm428_vm2, %v2760_v6 }
  0x2c   : > { %489 = vst.msk [vmem:[#allocation2 + $0x1e0] sm:$0xff] %vm428_vm2, %v2760_v6  ;;  %490 = vst.msk [vmem:[#allocation2 + $0x1e8] sm:$0xff] %vm428_vm2, %v2760_v6 }
  0x2d   : > { %491 = vst.msk [vmem:[#allocation2 + $0x1f0] sm:$0xff] %vm428_vm2, %v2760_v6  ;;  %492 = vst.msk [vmem:[#allocation2 + $0x1f8] sm:$0xff] %vm428_vm2, %v2760_v6 }
  0x31   : > { %2615 = vmatmul.mubr.msk.bf16.gmra.mxu0 %vm796_vm3, %v2712_v21  ;;  %2647 = vmatmul.mubr.msk.bf16.gmra.mxu1 %vm796_vm3, %v2713_v22 }
  0x32   : > { %2618 = vmatprep.mubr.msk.bf16.mxu0 %vm796_vm3, %v2714_v23  ;;  %2650 = vmatprep.mubr.msk.bf16.mxu1 %vm796_vm3, %v2715_v24 }
  0x39   : > { %2619 = vmatmul.mubr.msk.bf16.gmra.mxu0 %vm796_vm3, %v2716_v25  ;;  %2651 = vmatmul.mubr.msk.bf16.gmra.mxu1 %vm796_vm3, %v2717_v26 }
  0x3a   : > { %2622 = vmatprep.mubr.msk.bf16.mxu0 %vm796_vm3, %v2718_v27  ;;  %2654 = vmatprep.mubr.msk.bf16.mxu1 %vm796_vm3, %v2719_v28 }
  0x41   : > { %2623 = vmatmul.mubr.msk.bf16.gmra.mxu0 %vm796_vm3, %v2720_v29  ;;  %2655 = vmatmul.mubr.msk.bf16.gmra.mxu1 %vm796_vm3, %v2721_v30 }
  0x42   : > { %2626 = vmatprep.mubr.msk.bf16.mxu0 %vm796_vm3, %v2722_v31  ;;  %2658 = vmatprep.mubr.msk.bf16.mxu1 %vm796_vm3, %v2723_v32 }
  0x49   : > { %2627 = vmatmul.mubr.msk.bf16.gmra.mxu0 %vm796_vm3, %v2724_v33  ;;  %2659 = vmatmul.mubr.msk.bf16.gmra.mxu1 %vm796_vm3, %v2725_v34 }
  0x4a   : > { %2630 = vmatprep.mubr.msk.bf16.mxu0 %vm796_vm3, %v2726_v35  ;;  %2662 = vmatprep.mubr.msk.bf16.mxu1 %vm796_vm3, %v2727_v36  ;;  %v3093_v35 = vld [vmem:[%s3767_s5] ss:$0 sm:$0xff] }
  0x51   : > { %2631 = vmatmul.mubr.msk.bf16.gmra.mxu0 %vm796_vm3, %v2728_v37  ;;  %2663 = vmatmul.mubr.msk.bf16.gmra.mxu1 %vm796_vm3, %v2729_v38 }
  0xd9   : > { %v2604_v41 = vpop.f32.mrf.mxu0  ;;  %v2636_v42 = vpop.f32.mrf.mxu1 }
  0xda   : > { %v1191_v45 = vadd.f32 %v2604_v41, %v495_v39  ;;  %v1223_v46 = vadd.f32 %v2636_v42, %v527_v40 }
  0xdb   : > { %v934_v47 = vpop.f32.mrf.mxu0  ;;  %v1062_v48 = vpop.f32.mrf.mxu1 }
  0xdc   : > { %1256 = vst.msk [vmem:[#allocation2 + $0x10] sm:$0xff] %vm428_vm2, %v1191_v45  ;;  %1288 = vst.msk [vmem:[#allocation2 + $0x110] sm:$0xff] %vm428_vm2, %v1223_v46  ;;  %v1189_v51 = vadd.f32 %v934_v47, %v493_v43  ;;  %v1221_v52 = vadd.f32 %v1062_v48, %v525_v44  ;;  %v3109_v46 = vld [vmem:[%s3768_s6] ss:$0 sm:$0xff] }
  0xdd   : > { %v2605_v53 = vpop.f32.mrf.mxu0  ;;  %v2637_v54 = vpop.f32.mrf.mxu1 }
  0xde   : > { %1254 = vst.msk [vmem:[#allocation2] sm:$0xff] %vm428_vm2, %v1189_v51  ;;  %1286 = vst.msk [vmem:[#allocation2 + $0x100] sm:$0xff] %vm428_vm2, %v1221_v52  ;;  %v1192_v57 = vadd.f32 %v2605_v53, %v496_v49  ;;  %v1224_v58 = vadd.f32 %v2637_v54, %v528_v50 }
  0xdf   : > { %v937_v59 = vpop.f32.mrf.mxu0  ;;  %v1065_v60 = vpop.f32.mrf.mxu1 }
  0xe0   : > { %1257 = vst.msk [vmem:[#allocation2 + $0x18] sm:$0xff] %vm428_vm2, %v1192_v57  ;;  %1289 = vst.msk [vmem:[#allocation2 + $0x118] sm:$0xff] %vm428_vm2, %v1224_v58  ;;  %v1190_v63 = vadd.f32 %v937_v59, %v494_v55  ;;  %v1222_v0 = vadd.f32 %v1065_v60, %v526_v56 }
  0xe1   : > { %v2608_v2 = vpop.f32.mrf.mxu0  ;;  %v2640_v3 = vpop.f32.mrf.mxu1 }
  0xe2   : > { %1255 = vst.msk [vmem:[#allocation2 + $0x8] sm:$0xff] %vm428_vm2, %v1190_v63  ;;  %1287 = vst.msk [vmem:[#allocation2 + $0x108] sm:$0xff] %vm428_vm2, %v1222_v0  ;;  %v1195_v6 = vadd.f32 %v2608_v2, %v499_v61  ;;  %v1227_v7 = vadd.f32 %v2640_v3, %v531_v62 }
  0xe3   : > { %v1323_v8 = vld [vmem:[#allocation2 + $0x10] sm:$0xff]  ;;  %v950_v11 = vpop.f32.mrf.mxu0  ;;  %v1078_v12 = vpop.f32.mrf.mxu1 }
  0xe4   : > { %v1355_v10 = vld [vmem:[#allocation2 + $0x110] sm:$0xff]  ;;  %v1394_v13 = vmul.f32 %v3061_v1, %v1323_v8  ;;  %1260 = vst.msk [vmem:[#allocation2 + $0x30] sm:$0xff] %vm428_vm2, %v1195_v6  ;;  %1292 = vst.msk [vmem:[#allocation2 + $0x130] sm:$0xff] %vm428_vm2, %v1227_v7  ;;  %v1193_v15 = vadd.f32 %v950_v11, %v497_v4  ;;  %v1225_v16 = vadd.f32 %v1078_v12, %v529_v5 }
  0xe5   : > { %v1426_v14 = vmul.f32 %v3061_v1, %v1355_v10  ;;  %v1321_v20 = vld [vmem:[#allocation2] sm:$0xff]  ;;  %v2609_v22 = vpop.f32.mrf.mxu0  ;;  %v2641_v23 = vpop.f32.mrf.mxu1 }
  0xe6   : > { %v1353_v21 = vld [vmem:[#allocation2 + $0x100] sm:$0xff]  ;;  %v1465_v24 = vadd.f32 %v3068_v9, %v1394_v13  ;;  %v1392_v26 = vmul.f32 %v3061_v1, %v1321_v20  ;;  %1258 = vst.msk [vmem:[#allocation2 + $0x20] sm:$0xff] %vm428_vm2, %v1193_v15  ;;  %1290 = vst.msk [vmem:[#allocation2 + $0x120] sm:$0xff] %vm428_vm2, %v1225_v16  ;;  %v1196_v30 = vadd.f32 %v2609_v22, %v500_v17 }
  0xe7   : > { %v1497_v25 = vadd.f32 %v3068_v9, %v1426_v14  ;;  %v1424_v27 = vmul.f32 %v3061_v1, %v1353_v21  ;;  %v1324_v28 = vld [vmem:[#allocation2 + $0x18] sm:$0xff]  ;;  %v1228_v31 = vadd.f32 %v2641_v23, %v532_v18  ;;  %v3085_v32 = vpop.f32.mrf.mxu0  ;;  %v3087_v33 = vpop.f32.mrf.mxu1 }
  0xe8   : > { %v1356_v29 = vld [vmem:[#allocation2 + $0x118] sm:$0xff]  ;;  %vm1529_vm5 = vcmp.gt.f32.partialorder %v1465_v24, 0.0  ;;  %v1600_v34 = vmul.f32 %v3077_v19, %v1465_v24  ;;  %v1463_v37 = vadd.f32 %v3068_v9, %v1392_v26  ;;  %v1395_v39 = vmul.f32 %v3061_v1, %v1324_v28  ;;  %1261 = vst.msk [vmem:[#allocation2 + $0x38] sm:$0xff] %vm428_vm2, %v1196_v30 }
  0xe9   : > { %vm1561_vm6 = vcmp.gt.f32.partialorder %v1497_v25, 0.0  ;;  %v1632_v36 = vmul.f32 %v3077_v19, %v1497_v25  ;;  %v1495_v38 = vadd.f32 %v3068_v9, %v1424_v27  ;;  %v1427_v40 = vmul.f32 %v3061_v1, %v1356_v29  ;;  %v1322_v41 = vld [vmem:[#allocation2 + $0x8] sm:$0xff]  ;;  %1293 = vst.msk [vmem:[#allocation2 + $0x138] sm:$0xff] %vm428_vm2, %v1228_v31  ;;  %v3102_v43 = vpop.f32.mrf.mxu0  ;;  %v3104_v44 = vpop.f32.mrf.mxu1 }
  0xea   : > { %v1354_v42 = vld [vmem:[#allocation2 + $0x108] sm:$0xff]  ;;  %v1664_v45 = vsel %vm1529_vm5, %v1465_v24, %v1600_v34  ;;  %v1393_v48 = vmul.f32 %v3061_v1, %v1322_v41  ;;  %vm1527_vm7 = vcmp.gt.f32.partialorder %v1463_v37, 0.0  ;;  %v1598_v52 = vmul.f32 %v3077_v19, %v1463_v37 }
  0xeb   : > { %v1696_v47 = vsel %vm1561_vm6, %v1497_v25, %v1632_v36  ;;  %v1425_v49 = vmul.f32 %v3061_v1, %v1354_v42  ;;  %v1735_v50 = vmul.f32 %v3093_v35, %v1664_v45  ;;  %v3116_v53 = vpop.f32.mrf.mxu0  ;;  %v3118_v54 = vpop.f32.mrf.mxu1  ;;  %vm1559_vm8 = vcmp.gt.f32.partialorder %v1495_v38, 0.0  ;;  %v1327_v7 = vld [vmem:[#allocation2 + $0x30] sm:$0xff] }
  0xec   : > { %v1767_v51 = vmul.f32 %v3093_v35, %v1696_v47  ;;  %v1630_v55 = vmul.f32 %v3077_v19, %v1495_v38  ;;  %v1466_v56 = vadd.f32 %v3068_v9, %v1395_v39  ;;  %v1498_v57 = vadd.f32 %v3068_v9, %v1427_v40  ;;  %v1359_v8 = vld [vmem:[#allocation2 + $0x130] sm:$0xff] }
  0xed   : > { %v1806_v58 = vadd.f32 %v3109_v46, %v1735_v50  ;;  %v1662_v60 = vsel %vm1527_vm7, %v1463_v37, %v1598_v52  ;;  %v1464_v61 = vadd.f32 %v3068_v9, %v1393_v48  ;;  %v3126_v62 = vpop.f32.mrf.mxu0  ;;  %v3128_v63 = vpop.f32.mrf.mxu1  ;;  %v1496_v18 = vadd.f32 %v3068_v9, %v1425_v49  ;;  %v1325_v26 = vld [vmem:[#allocation2 + $0x20] sm:$0xff] }
  0xee   : > { %v1838_v59 = vadd.f32 %v3109_v46, %v1767_v51  ;;  %v1733_v0 = vmul.f32 %v3093_v35, %v1662_v60  ;;  %v1694_v2 = vsel %vm1559_vm8, %v1495_v38, %v1630_v55  ;;  %vm1530_vm9 = vcmp.gt.f32.partialorder %v1466_v56, 0.0  ;;  %v1357_v45 = vld [vmem:[#allocation2 + $0x120] sm:$0xff] }
  0xef   : > { %v1601_v3 = vmul.f32 %v3077_v19, %v1466_v56  ;;  %v2502_v4 = vpack.c.bf16 %v1806_v58, %v1806_v58  ;;  %v1765_v6 = vmul.f32 %v3093_v35, %v1694_v2  ;;  %vm1562_vm10 = vcmp.gt.f32.partialorder %v1498_v57, 0.0  ;;  %v3140_v10 = vpop.f32.mrf.mxu0  ;;  %v3142_v11 = vpop.f32.mrf.mxu1  ;;  %v1328_v52 = vld [vmem:[#allocation2 + $0x38] sm:$0xff] }
  0xf0   : > { %v2534_v5 = vpack.c.bf16 %v1838_v59, %v1838_v59  ;;  %v1804_v12 = vadd.f32 %v3109_v46, %v1733_v0  ;;  %v1633_v14 = vmul.f32 %v3077_v19, %v1498_v57  ;;  %vm1528_vm11 = vcmp.gt.f32.partialorder %v1464_v61, 0.0 }
  0xf1   : > { %v1665_v13 = vsel %vm1530_vm9, %v1466_v56, %v1601_v3  ;;  %2127 = vst.msk [vmem:[%s3135_s8 + $0x8] sm:$0xf] %vm2124_vm4, %v2502_v4  ;;  %v1836_v15 = vadd.f32 %v3109_v46, %v1765_v6  ;;  %v1599_v17 = vmul.f32 %v3077_v19, %v1464_v61  ;;  %v3154_v20 = vpop.f32.mrf.mxu0  ;;  %v3156_v21 = vpop.f32.mrf.mxu1  ;;  %v1398_v24 = vmul.f32 %v3061_v1, %v1327_v7  ;;  %v1360_v3 = vld [vmem:[#allocation2 + $0x138] sm:$0xff] }
  0xf2   : > { %2159 = vst.msk [vmem:[%s3135_s8 + $0x88] sm:$0xf] %vm2124_vm4, %v2534_v5  ;;  %v1736_v16 = vmul.f32 %v3093_v35, %v1665_v13  ;;  %v2500_v22 = vpack.c.bf16 %v1804_v12, %v1804_v12  ;;  %v1697_v23 = vsel %vm1562_vm10, %v1498_v57, %v1633_v14  ;;  %v1430_v25 = vmul.f32 %v3061_v1, %v1359_v8 }
  0xf3   : > { %v2532_v27 = vpack.c.bf16 %v1836_v15, %v1836_v15  ;;  %v1768_v29 = vmul.f32 %v3093_v35, %v1697_v23  ;;  %v1663_v30 = vsel %vm1528_vm11, %v1464_v61, %v1599_v17  ;;  %v3164_v31 = vpop.f32.mrf.mxu0  ;;  %v3166_v34 = vpop.f32.mrf.mxu1  ;;  %vm1560_vm12 = vcmp.gt.f32.partialorder %v1496_v18, 0.0  ;;  %v498_v23 = vld [vmem:[#allocation2 + $0x28] sm:$0xff] }
  0xf4   : > { %v1807_v28 = vadd.f32 %v3109_v46, %v1736_v16  ;;  %2125 = vst.msk [vmem:[%s3135_s8] sm:$0xf] %vm2124_vm4, %v2500_v22  ;;  %v1734_v36 = vmul.f32 %v3093_v35, %v1663_v30  ;;  %v1631_v37 = vmul.f32 %v3077_v19, %v1496_v18  ;;  %v1469_v38 = vadd.f32 %v3068_v9, %v1398_v24 }
  0xf5   : > { %2157 = vst.msk [vmem:[%s3135_s8 + $0x80] sm:$0xf] %vm2124_vm4, %v2532_v27  ;;  %v1839_v40 = vadd.f32 %v3109_v46, %v1768_v29  ;;  %v1501_v41 = vadd.f32 %v3068_v9, %v1430_v25  ;;  %v1396_v42 = vmul.f32 %v3061_v1, %v1325_v26  ;;  %v3178_v47 = vpop.f32.mrf.mxu0  ;;  %v3180_v48 = vpop.f32.mrf.mxu1  ;;  %v1428_v2 = vmul.f32 %v3061_v1, %v1357_v45  ;;  %v530_v29 = vld [vmem:[#allocation2 + $0x128] sm:$0xff] }
  0xf6   : > { %v2503_v39 = vpack.c.bf16 %v1807_v28, %v1807_v28  ;;  %v1805_v49 = vadd.f32 %v3109_v46, %v1734_v36  ;;  %v1695_v50 = vsel %vm1560_vm12, %v1496_v18, %v1631_v37  ;;  %vm1533_vm13 = vcmp.gt.f32.partialorder %v1469_v38, 0.0 }
  0xf7   : > { %v1604_v51 = vmul.f32 %v3077_v19, %v1469_v38  ;;  %v2535_v55 = vpack.c.bf16 %v1839_v40, %v1839_v40  ;;  %v1766_v56 = vmul.f32 %v3093_v35, %v1695_v50  ;;  %vm1565_vm14 = vcmp.gt.f32.partialorder %v1501_v41, 0.0  ;;  %v3188_v58 = vpop.f32.mrf.mxu0  ;;  %v3190_v59 = vpop.f32.mrf.mxu1  ;;  %v535_v50 = vld [vmem:[#allocation2 + $0x150] sm:$0xff] }
  0xf8   : > { %2128 = vst.msk [vmem:[%s3135_s8 + $0xc] sm:$0xf] %vm2124_vm4, %v2503_v39  ;;  %v1636_v57 = vmul.f32 %v3077_v19, %v1501_v41  ;;  %v2501_v60 = vpack.c.bf16 %v1805_v49, %v1805_v49  ;;  %v1467_v0 = vadd.f32 %v3068_v9, %v1396_v42  ;;  %v1399_v7 = vmul.f32 %v3061_v1, %v1328_v52 }
  0xf9   : > { %v1668_v61 = vsel %vm1533_vm13, %v1469_v38, %v1604_v51  ;;  %2160 = vst.msk [vmem:[%s3135_s8 + $0x8c] sm:$0xf] %vm2124_vm4, %v2535_v55  ;;  %v1837_v4 = vadd.f32 %v3109_v46, %v1766_v56  ;;  %v3199_v8 = vpop.f32.mrf.mxu0  ;;  %v3201_v12 = vpop.f32.mrf.mxu1  ;;  %v1499_v15 = vadd.f32 %v3068_v9, %v1428_v2  ;;  %v1431_v22 = vmul.f32 %v3061_v1, %v1360_v3  ;;  %v503_v38 = vld [vmem:[#allocation2 + $0x50] sm:$0xff]  ;;  %v501_v51 = vld [vmem:[#allocation2 + $0x40] sm:$0xff] }
  0xfa   : > { %v1739_v5 = vmul.f32 %v3093_v35, %v1668_v61  ;;  %v1700_v6 = vsel %vm1565_vm14, %v1501_v41, %v1636_v57  ;;  %2126 = vst.msk [vmem:[%s3135_s8 + $0x4] sm:$0xf] %vm2124_vm4, %v2501_v60  ;;  %vm1531_vm15 = vcmp.gt.f32.partialorder %v1467_v0, 0.0  ;;  %v1602_v14 = vmul.f32 %v3077_v19, %v1467_v0  ;;  %v533_v60 = vld [vmem:[#allocation2 + $0x140] sm:$0xff]  ;;  %v504_v61 = vld [vmem:[#allocation2 + $0x58] sm:$0xff] }
  0xfb   : > { %v1771_v13 = vmul.f32 %v3093_v35, %v1700_v6  ;;  %v2533_v16 = vpack.c.bf16 %v1837_v4, %v1837_v4  ;;  %v1470_v18 = vadd.f32 %v3068_v9, %v1399_v7  ;;  %v3211_v24 = vpop.f32.mrf.mxu0  ;;  %v3213_v25 = vpop.f32.mrf.mxu1  ;;  %vm1563_vm0 = vcmp.gt.f32.partialorder %v1499_v15, 0.0  ;;  %v502_v6 = vld [vmem:[#allocation2 + $0x48] sm:$0xff] }
  0xfc   : > { %v1810_v17 = vadd.f32 %v3109_v46, %v1739_v5  ;;  %v1666_v27 = vsel %vm1531_vm15, %v1467_v0, %v1602_v14  ;;  %v1634_v28 = vmul.f32 %v3077_v19, %v1499_v15  ;;  %v1502_v45 = vadd.f32 %v3068_v9, %v1431_v22  ;;  %v536_v5 = vld [vmem:[#allocation2 + $0x158] sm:$0xff] }
  0xfd   : > { %v1842_v26 = vadd.f32 %v3109_v46, %v1771_v13  ;;  %2158 = vst.msk [vmem:[%s3135_s8 + $0x84] sm:$0xf] %vm2124_vm4, %v2533_v16  ;;  %v1737_v36 = vmul.f32 %v3093_v35, %v1666_v27  ;;  %vm1534_vm1 = vcmp.gt.f32.partialorder %v1470_v18, 0.0  ;;  %v1605_v37 = vmul.f32 %v3077_v19, %v1470_v18  ;;  %v3221_v39 = vpop.f32.mrf.mxu0  ;;  %v3223_v40 = vpop.f32.mrf.mxu1  ;;  %v507_v16 = vld [vmem:[#allocation2 + $0x70] sm:$0xff] }
  0xfe   : > { %v2506_v30 = vpack.c.bf16 %v1810_v17, %v1810_v17  ;;  %v1698_v42 = vsel %vm1563_vm0, %v1499_v15, %v1634_v28  ;;  %v1194_v49 = vadd.f32 %v3085_v32, %v498_v23  ;;  %v1226_v57 = vadd.f32 %v3087_v33, %v530_v29  ;;  %v534_v33 = vld [vmem:[#allocation2 + $0x148] sm:$0xff]  ;;  %v539_v17 = vld [vmem:[#allocation2 + $0x170] sm:$0xff]  ;;  %v537_v28 = vld [vmem:[#allocation2 + $0x160] sm:$0xff] }
  0xff   : > { %v2538_v41 = vpack.c.bf16 %v1842_v26, %v1842_v26  ;;  %v1808_v52 = vadd.f32 %v3109_v46, %v1737_v36  ;;  %v1769_v55 = vmul.f32 %v3093_v35, %v1698_v42  ;;  %v1669_v56 = vsel %vm1534_vm1, %v1470_v18, %v1605_v37  ;;  %v3232_v0 = vpop.f32.mrf.mxu0  ;;  %v3234_v2 = vpop.f32.mrf.mxu1  ;;  %v505_v18 = vld [vmem:[#allocation2 + $0x60] sm:$0xff]  ;;  %v508_v29 = vld [vmem:[#allocation2 + $0x78] sm:$0xff] }
 0x100   : > { %2131 = vst.msk [vmem:[%s3135_s8 + $0x18] sm:$0xf] %vm2124_vm4, %v2506_v30  ;;  %v1740_v32 = vmul.f32 %v3093_v35, %v1669_v56  ;;  %vm1566_vm3 = vcmp.gt.f32.partialorder %v1502_v45, 0.0  ;;  %v1637_v3 = vmul.f32 %v3077_v19, %v1502_v45  ;;  %v1199_v4 = vadd.f32 %v3102_v43, %v503_v38  ;;  %v538_v38 = vld [vmem:[#allocation2 + $0x168] sm:$0xff] }
 0x101   : > { %2163 = vst.msk [vmem:[%s3135_s8 + $0x98] sm:$0xf] %vm2124_vm4, %v2538_v41  ;;  %v2504_v7 = vpack.c.bf16 %v1808_v52, %v1808_v52  ;;  %v1840_v13 = vadd.f32 %v3109_v46, %v1769_v55  ;;  %v1231_v14 = vadd.f32 %v3104_v44, %v535_v50  ;;  %v1197_v15 = vadd.f32 %v3116_v53, %v501_v51  ;;  %v3246_v22 = vpop.f32.mrf.mxu0  ;;  %v540_v44 = vld [vmem:[#allocation2 + $0x178] sm:$0xff]  ;;  %v2656_v41 = vpop.f32.mrf.mxu1  ;;  %v509_v51 = vld [vmem:[#allocation2 + $0x80] sm:$0xff] }
 0x102   : > { %1259 = vst.msk [vmem:[#allocation2 + $0x28] sm:$0xff] %vm428_vm2, %v1194_v49  ;;  %1291 = vst.msk [vmem:[#allocation2 + $0x128] sm:$0xff] %vm428_vm2, %v1226_v57  ;;  %v1811_v43 = vadd.f32 %v3109_v46, %v1740_v32  ;;  %v1701_v23 = vsel %vm1566_vm3, %v1502_v45, %v1637_v3  ;;  %v1229_v26 = vadd.f32 %v3118_v54, %v533_v60  ;;  %v506_v54 = vld [vmem:[#allocation2 + $0x68] sm:$0xff]  ;;  %v541_v52 = vld [vmem:[#allocation2 + $0x180] sm:$0xff] }
 0x103   : > { %1264 = vst.msk [vmem:[#allocation2 + $0x50] sm:$0xff] %vm428_vm2, %v1199_v4  ;;  %v1200_v27 = vadd.f32 %v3126_v62, %v504_v61  ;;  %v2536_v53 = vpack.c.bf16 %v1840_v13, %v1840_v13  ;;  %v1772_v30 = vmul.f32 %v3093_v35, %v1701_v23  ;;  %1296 = vst.msk [vmem:[#allocation2 + $0x150] sm:$0xff] %vm428_vm2, %v1231_v14  ;;  %v511_v62 = vld [vmem:[#allocation2 + $0x90] sm:$0xff]  ;;  %v512_v57 = vld [vmem:[#allocation2 + $0x98] sm:$0xff] }
 0x104   : > { %2129 = vst.msk [vmem:[%s3135_s8 + $0x10] sm:$0xf] %vm2124_vm4, %v2504_v7  ;;  %v1232_v36 = vadd.f32 %v3128_v63, %v536_v5  ;;  %v1198_v37 = vadd.f32 %v3140_v10, %v502_v6  ;;  %v2507_v42 = vpack.c.bf16 %v1811_v43, %v1811_v43  ;;  %v1230_v45 = vadd.f32 %v3142_v11, %v534_v33  ;;  %v543_v63 = vld [vmem:[#allocation2 + $0x190] sm:$0xff]  ;;  %v1014_v10 = vpop.f32.mrf.mxu0  ;;  %v510_v60 = vld [vmem:[#allocation2 + $0x88] sm:$0xff]  ;;  %v1142_v7 = vpop.f32.mrf.mxu1 }
 0x105   : > { %1262 = vst.msk [vmem:[#allocation2 + $0x40] sm:$0xff] %vm428_vm2, %v1197_v15  ;;  %1294 = vst.msk [vmem:[#allocation2 + $0x140] sm:$0xff] %vm428_vm2, %v1229_v26  ;;  %v1203_v49 = vadd.f32 %v3154_v20, %v507_v16  ;;  %v1235_v50 = vadd.f32 %v3156_v21, %v539_v17  ;;  %v1843_v55 = vadd.f32 %v3109_v46, %v1772_v30  ;;  %v544_v21 = vld [vmem:[#allocation2 + $0x198] sm:$0xff]  ;;  %v515_v3 = vld [vmem:[#allocation2 + $0xb0] sm:$0xff] }
 0x106   : > { %1265 = vst.msk [vmem:[#allocation2 + $0x58] sm:$0xff] %vm428_vm2, %v1200_v27  ;;  %1297 = vst.msk [vmem:[#allocation2 + $0x158] sm:$0xff] %vm428_vm2, %v1232_v36  ;;  %v1201_v56 = vadd.f32 %v3164_v31, %v505_v18  ;;  %v1233_v11 = vadd.f32 %v3166_v34, %v537_v28  ;;  %v1204_v20 = vadd.f32 %v3178_v47, %v508_v29  ;;  %v542_v47 = vld [vmem:[#allocation2 + $0x188] sm:$0xff]  ;;  %v547_v4 = vld [vmem:[#allocation2 + $0x1b0] sm:$0xff]  ;;  %v2625_v16 = vpop.f32.mrf.mxu0 }
 0x107   : > { %2161 = vst.msk [vmem:[%s3135_s8 + $0x90] sm:$0xf] %vm2124_vm4, %v2536_v53  ;;  %2132 = vst.msk [vmem:[%s3135_s8 + $0x1c] sm:$0xf] %vm2124_vm4, %v2507_v42  ;;  %v1236_v61 = vadd.f32 %v3180_v48, %v540_v44  ;;  %v1202_v32 = vadd.f32 %v3188_v58, %v506_v54  ;;  %v1234_v31 = vadd.f32 %v3190_v59, %v538_v38  ;;  %v513_v59 = vld [vmem:[#allocation2 + $0xa0] sm:$0xff]  ;;  %v516_v15 = vld [vmem:[#allocation2 + $0xb8] sm:$0xff] }
 0x108   : > { %1263 = vst.msk [vmem:[#allocation2 + $0x48] sm:$0xff] %vm428_vm2, %v1198_v37  ;;  %1295 = vst.msk [vmem:[#allocation2 + $0x148] sm:$0xff] %vm428_vm2, %v1230_v45  ;;  %v1207_v34 = vadd.f32 %v3199_v8, %v511_v62  ;;  %v2539_v5 = vpack.c.bf16 %v1843_v55, %v1843_v55  ;;  %v1239_v33 = vadd.f32 %v3201_v12, %v543_v63  ;;  %v545_v8 = vld [vmem:[#allocation2 + $0x1a0] sm:$0xff] }
 0x109   : > { %1268 = vst.msk [vmem:[#allocation2 + $0x70] sm:$0xff] %vm428_vm2, %v1203_v49  ;;  %1300 = vst.msk [vmem:[#allocation2 + $0x170] sm:$0xff] %vm428_vm2, %v1235_v50  ;;  %v1326_v6 = vld [vmem:[#allocation2 + $0x28] sm:$0xff]  ;;  %v1205_v48 = vadd.f32 %v3211_v24, %v509_v51  ;;  %v1237_v58 = vadd.f32 %v3213_v25, %v541_v52  ;;  %v1208_v12 = vadd.f32 %v3221_v39, %v512_v57 }
 0x10a   : > { %1266 = vst.msk [vmem:[#allocation2 + $0x60] sm:$0xff] %vm428_vm2, %v1201_v56  ;;  %1298 = vst.msk [vmem:[#allocation2 + $0x160] sm:$0xff] %vm428_vm2, %v1233_v11  ;;  %v1397_v13 = vmul.f32 %v3061_v1, %v1326_v6  ;;  %v1358_v14 = vld [vmem:[#allocation2 + $0x128] sm:$0xff]  ;;  %v1240_v24 = vadd.f32 %v3223_v40, %v544_v21  ;;  %v1206_v25 = vadd.f32 %v3232_v0, %v510_v60  ;;  %v1331_v18 = vld [vmem:[#allocation2 + $0x50] sm:$0xff] }
 0x10b   : > { %1269 = vst.msk [vmem:[#allocation2 + $0x78] sm:$0xff] %vm428_vm2, %v1204_v20  ;;  %1301 = vst.msk [vmem:[#allocation2 + $0x178] sm:$0xff] %vm428_vm2, %v1236_v61  ;;  %v1429_v17 = vmul.f32 %v3061_v1, %v1358_v14  ;;  %v1238_v43 = vadd.f32 %v3234_v2, %v542_v47  ;;  %v1211_v39 = vadd.f32 %v3246_v22, %v515_v3  ;;  %v1363_v26 = vld [vmem:[#allocation2 + $0x150] sm:$0xff] }
 0x10c   : > { %1267 = vst.msk [vmem:[#allocation2 + $0x68] sm:$0xff] %vm428_vm2, %v1202_v32  ;;  %1299 = vst.msk [vmem:[#allocation2 + $0x168] sm:$0xff] %vm428_vm2, %v1234_v31  ;;  %v1243_v40 = vadd.f32 %v2656_v41, %v547_v4  ;;  %v1468_v0 = vadd.f32 %v3068_v9, %v1397_v13  ;;  %v1402_v23 = vmul.f32 %v3061_v1, %v1331_v18  ;;  %v1329_v27 = vld [vmem:[#allocation2 + $0x40] sm:$0xff] }
 0x10d   : > { %1272 = vst.msk [vmem:[#allocation2 + $0x90] sm:$0xff] %vm428_vm2, %v1207_v34  ;;  %1304 = vst.msk [vmem:[#allocation2 + $0x190] sm:$0xff] %vm428_vm2, %v1239_v33  ;;  %v1209_v28 = vadd.f32 %v1014_v10, %v513_v59  ;;  %v1241_v29 = vadd.f32 %v1142_v7, %v545_v8  ;;  %v1500_v44 = vadd.f32 %v3068_v9, %v1429_v17  ;;  %v1361_v53 = vld [vmem:[#allocation2 + $0x140] sm:$0xff]  ;;  %v1332_v56 = vld [vmem:[#allocation2 + $0x58] sm:$0xff] }
 0x10e   : > { %2164 = vst.msk [vmem:[%s3135_s8 + $0x9c] sm:$0xf] %vm2124_vm4, %v2539_v5  ;;  %v1434_v2 = vmul.f32 %v3061_v1, %v1363_v26  ;;  %v1400_v22 = vmul.f32 %v3061_v1, %v1329_v27  ;;  %v1212_v30 = vadd.f32 %v2625_v16, %v516_v15  ;;  %vm1532_vm5 = vcmp.gt.f32.partialorder %v1468_v0, 0.0  ;;  %v1364_v21 = vld [vmem:[#allocation2 + $0x158] sm:$0xff] }
 0x10f   : > { %1270 = vst.msk [vmem:[#allocation2 + $0x80] sm:$0xff] %vm428_vm2, %v1205_v48  ;;  %1302 = vst.msk [vmem:[#allocation2 + $0x180] sm:$0xff] %vm428_vm2, %v1237_v58  ;;  %v1603_v36 = vmul.f32 %v3077_v19, %v1468_v0  ;;  %v1473_v37 = vadd.f32 %v3068_v9, %v1402_v23  ;;  %v1432_v54 = vmul.f32 %v3061_v1, %v1361_v53  ;;  %vm1564_vm6 = vcmp.gt.f32.partialorder %v1500_v44, 0.0  ;;  %v1330_v5 = vld [vmem:[#allocation2 + $0x48] sm:$0xff] }
 0x110   : > { %1273 = vst.msk [vmem:[#allocation2 + $0x98] sm:$0xff] %vm428_vm2, %v1208_v12  ;;  %1305 = vst.msk [vmem:[#allocation2 + $0x198] sm:$0xff] %vm428_vm2, %v1240_v24  ;;  %v1635_v38 = vmul.f32 %v3077_v19, %v1500_v44  ;;  %v1505_v62 = vadd.f32 %v3068_v9, %v1434_v2  ;;  %v1471_v41 = vadd.f32 %v3068_v9, %v1400_v22  ;;  %v1362_v6 = vld [vmem:[#allocation2 + $0x148] sm:$0xff]  ;;  %v1335_v16 = vld [vmem:[#allocation2 + $0x70] sm:$0xff] }
 0x111   : > { %1271 = vst.msk [vmem:[#allocation2 + $0x88] sm:$0xff] %vm428_vm2, %v1206_v25  ;;  %1303 = vst.msk [vmem:[#allocation2 + $0x188] sm:$0xff] %vm428_vm2, %v1238_v43  ;;  %v1667_v42 = vsel %vm1532_vm5, %v1468_v0, %v1603_v36  ;;  %vm1537_vm7 = vcmp.gt.f32.partialorder %v1473_v37, 0.0  ;;  %v1608_v45 = vmul.f32 %v3077_v19, %v1473_v37  ;;  %v1503_v49 = vadd.f32 %v3068_v9, %v1432_v54  ;;  %v1367_v17 = vld [vmem:[#allocation2 + $0x170] sm:$0xff] }
 0x112   : > { %1276 = vst.msk [vmem:[#allocation2 + $0xb0] sm:$0xff] %vm428_vm2, %v1211_v39  ;;  %1308 = vst.msk [vmem:[#allocation2 + $0x1b0] sm:$0xff] %vm428_vm2, %v1243_v40  ;;  %v1738_v50 = vmul.f32 %v3093_v35, %v1667_v42  ;;  %v1699_v63 = vsel %vm1564_vm6, %v1500_v44, %v1635_v38  ;;  %vm1569_vm8 = vcmp.gt.f32.partialorder %v1505_v62, 0.0  ;;  %v1640_v51 = vmul.f32 %v3077_v19, %v1505_v62  ;;  %v1333_v44 = vld [vmem:[#allocation2 + $0x60] sm:$0xff] }
 0x113   : > { %1274 = vst.msk [vmem:[#allocation2 + $0xa0] sm:$0xff] %vm428_vm2, %v1209_v28  ;;  %1306 = vst.msk [vmem:[#allocation2 + $0x1a0] sm:$0xff] %vm428_vm2, %v1241_v29  ;;  %v1770_v52 = vmul.f32 %v3093_v35, %v1699_v63  ;;  %v1672_v10 = vsel %vm1537_vm7, %v1473_v37, %v1608_v45  ;;  %vm1535_vm9 = vcmp.gt.f32.partialorder %v1471_v41, 0.0  ;;  %v1606_v55 = vmul.f32 %v3077_v19, %v1471_v41  ;;  %v1336_v63 = vld [vmem:[#allocation2 + $0x78] sm:$0xff] }
 0x114   : > { %1277 = vst.msk [vmem:[#allocation2 + $0xb8] sm:$0xff] %vm428_vm2, %v1212_v30  ;;  %v1809_v11 = vadd.f32 %v3109_v46, %v1738_v50  ;;  %v1743_v20 = vmul.f32 %v3093_v35, %v1672_v10  ;;  %v1704_v57 = vsel %vm1569_vm8, %v1505_v62, %v1640_v51  ;;  %vm1567_vm10 = vcmp.gt.f32.partialorder %v1503_v49, 0.0  ;;  %v1365_v50 = vld [vmem:[#allocation2 + $0x160] sm:$0xff] }
 0x115   : > { %v1841_v60 = vadd.f32 %v3109_v46, %v1770_v52  ;;  %v1775_v61 = vmul.f32 %v3093_v35, %v1704_v57  ;;  %v1670_v32 = vsel %vm1535_vm9, %v1471_v41, %v1606_v55  ;;  %v1638_v31 = vmul.f32 %v3077_v19, %v1503_v49 }
 0x116   : > { %v2505_v34 = vpack.c.bf16 %v1809_v11, %v1809_v11  ;;  %v1814_v47 = vadd.f32 %v3109_v46, %v1743_v20  ;;  %v1741_v3 = vmul.f32 %v3093_v35, %v1670_v32  ;;  %v1403_v4 = vmul.f32 %v3061_v1, %v1332_v56  ;;  %v1368_v32 = vld [vmem:[#allocation2 + $0x178] sm:$0xff] }
 0x117   : > { %v2537_v33 = vpack.c.bf16 %v1841_v60, %v1841_v60  ;;  %v1846_v48 = vadd.f32 %v3109_v46, %v1775_v61  ;;  %v1702_v58 = vsel %vm1567_vm10, %v1503_v49, %v1638_v31  ;;  %v1435_v59 = vmul.f32 %v3061_v1, %v1364_v21  ;;  %v1334_v31 = vld [vmem:[#allocation2 + $0x68] sm:$0xff] }
 0x118   : > { %2130 = vst.msk [vmem:[%s3135_s8 + $0x14] sm:$0xf] %vm2124_vm4, %v2505_v34  ;;  %v2510_v8 = vpack.c.bf16 %v1814_v47, %v1814_v47  ;;  %v1812_v7 = vadd.f32 %v3109_v46, %v1741_v3  ;;  %v1773_v13 = vmul.f32 %v3093_v35, %v1702_v58  ;;  %v1474_v14 = vadd.f32 %v3068_v9, %v1403_v4 }
 0x119   : > { %2162 = vst.msk [vmem:[%s3135_s8 + $0x94] sm:$0xf] %vm2124_vm4, %v2537_v33  ;;  %v2542_v12 = vpack.c.bf16 %v1846_v48, %v1846_v48  ;;  %v1506_v24 = vadd.f32 %v3068_v9, %v1435_v59  ;;  %v1401_v25 = vmul.f32 %v3061_v1, %v1330_v5  ;;  %v1433_v15 = vmul.f32 %v3061_v1, %v1362_v6 }
 0x11a   : > { %2135 = vst.msk [vmem:[%s3135_s8 + $0x28] sm:$0xf] %vm2124_vm4, %v2510_v8  ;;  %v2508_v18 = vpack.c.bf16 %v1812_v7, %v1812_v7  ;;  %v1844_v43 = vadd.f32 %v3109_v46, %v1773_v13  ;;  %vm1538_vm11 = vcmp.gt.f32.partialorder %v1474_v14, 0.0  ;;  %v1609_v39 = vmul.f32 %v3077_v19, %v1474_v14 }
 0x11b   : > { %2167 = vst.msk [vmem:[%s3135_s8 + $0xa8] sm:$0xf] %vm2124_vm4, %v2542_v12  ;;  %vm1570_vm12 = vcmp.gt.f32.partialorder %v1506_v24, 0.0  ;;  %v1641_v40 = vmul.f32 %v3077_v19, %v1506_v24  ;;  %v1472_v0 = vadd.f32 %v3068_v9, %v1401_v25  ;;  %v1504_v23 = vadd.f32 %v3068_v9, %v1433_v15  ;;  %v1366_v12 = vld [vmem:[#allocation2 + $0x168] sm:$0xff] }
 0x11c   : > { %2133 = vst.msk [vmem:[%s3135_s8 + $0x20] sm:$0xf] %vm2124_vm4, %v2508_v18  ;;  %v2540_v26 = vpack.c.bf16 %v1844_v43, %v1844_v43  ;;  %v1673_v27 = vsel %vm1538_vm11, %v1474_v14, %v1609_v39  ;;  %v1406_v28 = vmul.f32 %v3061_v1, %v1335_v16  ;;  %v1438_v29 = vmul.f32 %v3061_v1, %v1367_v17  ;;  %v3403_v16 = vpop.f32.mrf.mxu1 }
 0x11d   : > { %v1744_v2 = vmul.f32 %v3093_v35, %v1673_v27  ;;  %v1705_v22 = vsel %vm1570_vm12, %v1506_v24, %v1641_v40  ;;  %vm1536_vm13 = vcmp.gt.f32.partialorder %v1472_v0, 0.0  ;;  %v1607_v53 = vmul.f32 %v3077_v19, %v1472_v0  ;;  %v1339_v27 = vld [vmem:[#allocation2 + $0x90] sm:$0xff] }
 0x11e   : > { %2165 = vst.msk [vmem:[%s3135_s8 + $0xa0] sm:$0xf] %vm2124_vm4, %v2540_v26  ;;  %v1776_v30 = vmul.f32 %v3093_v35, %v1705_v22  ;;  %vm1568_vm14 = vcmp.gt.f32.partialorder %v1504_v23, 0.0  ;;  %v1639_v36 = vmul.f32 %v3077_v19, %v1504_v23  ;;  %v1477_v37 = vadd.f32 %v3068_v9, %v1406_v28  ;;  %v1371_v28 = vld [vmem:[#allocation2 + $0x190] sm:$0xff] }
 0x11f   : > { %v1815_v54 = vadd.f32 %v3109_v46, %v1744_v2  ;;  %v1671_v38 = vsel %vm1536_vm13, %v1472_v0, %v1607_v53  ;;  %v1509_v62 = vadd.f32 %v3068_v9, %v1438_v29  ;;  %v1404_v41 = vmul.f32 %v3061_v1, %v1333_v44 }
 0x120   : > { %v1847_v42 = vadd.f32 %v3109_v46, %v1776_v30  ;;  %v1742_v45 = vmul.f32 %v3093_v35, %v1671_v38  ;;  %v1703_v49 = vsel %vm1568_vm14, %v1504_v23, %v1639_v36  ;;  %vm1541_vm15 = vcmp.gt.f32.partialorder %v1477_v37, 0.0  ;;  %v3419_v36 = vpop.f32.mrf.mxu0 }
 0x121   : > { %v2511_v51 = vpack.c.bf16 %v1815_v54, %v1815_v54  ;;  %v1774_v52 = vmul.f32 %v3093_v35, %v1703_v49  ;;  %v1612_v10 = vmul.f32 %v3077_v19, %v1477_v37  ;;  %vm1573_vm0 = vcmp.gt.f32.partialorder %v1509_v62, 0.0 }
 0x122   : > { %v2543_v55 = vpack.c.bf16 %v1847_v42, %v1847_v42  ;;  %v1813_v56 = vadd.f32 %v3109_v46, %v1742_v45  ;;  %v1644_v11 = vmul.f32 %v3077_v19, %v1509_v62  ;;  %v1475_v20 = vadd.f32 %v3068_v9, %v1404_v41  ;;  %v1337_v42 = vld [vmem:[#allocation2 + $0x80] sm:$0xff] }
 0x123   : > { %2136 = vst.msk [vmem:[%s3135_s8 + $0x2c] sm:$0xf] %vm2124_vm4, %v2511_v51  ;;  %v1845_v57 = vadd.f32 %v3109_v46, %v1774_v52  ;;  %v1676_v21 = vsel %vm1541_vm15, %v1477_v37, %v1612_v10  ;;  %v1436_v60 = vmul.f32 %v3061_v1, %v1365_v50  ;;  %v1407_v61 = vmul.f32 %v3061_v1, %v1336_v63  ;;  %v3421_v37 = vpop.f32.mrf.mxu1  ;;  %v1369_v45 = vld [vmem:[#allocation2 + $0x180] sm:$0xff] }
 0x124   : > { %2168 = vst.msk [vmem:[%s3135_s8 + $0xac] sm:$0xf] %vm2124_vm4, %v2543_v55  ;;  %v2509_v34 = vpack.c.bf16 %v1813_v56, %v1813_v56  ;;  %v1747_v47 = vmul.f32 %v3093_v35, %v1676_v21  ;;  %v1708_v3 = vsel %vm1573_vm0, %v1509_v62, %v1644_v11  ;;  %vm1539_vm1 = vcmp.gt.f32.partialorder %v1475_v20, 0.0  ;;  %v3439_v21 = vpop.f32.mrf.mxu0 }
 0x125   : > { %v2541_v4 = vpack.c.bf16 %v1845_v57, %v1845_v57  ;;  %v1779_v5 = vmul.f32 %v3093_v35, %v1708_v3  ;;  %v1610_v6 = vmul.f32 %v3077_v19, %v1475_v20  ;;  %v1507_v33 = vadd.f32 %v3068_v9, %v1436_v60  ;;  %v3441_v60 = vpop.f32.mrf.mxu1 }
 0x126   : > { %2134 = vst.msk [vmem:[%s3135_s8 + $0x24] sm:$0xf] %vm2124_vm4, %v2509_v34  ;;  %v1818_v48 = vadd.f32 %v3109_v46, %v1747_v47  ;;  %v1478_v58 = vadd.f32 %v3068_v9, %v1407_v61  ;;  %v1439_v59 = vmul.f32 %v3061_v1, %v1368_v32  ;;  %v1405_v8 = vmul.f32 %v3061_v1, %v1334_v31  ;;  %v1340_v34 = vld [vmem:[#allocation2 + $0x98] sm:$0xff] }
 0x127   : > { %2166 = vst.msk [vmem:[%s3135_s8 + $0xa4] sm:$0xf] %vm2124_vm4, %v2541_v4  ;;  %v1850_v7 = vadd.f32 %v3109_v46, %v1779_v5  ;;  %v1674_v13 = vsel %vm1539_vm1, %v1475_v20, %v1610_v6  ;;  %vm1571_vm3 = vcmp.gt.f32.partialorder %v1507_v33, 0.0  ;;  %v1642_v14 = vmul.f32 %v3077_v19, %v1507_v33 }
 0x128   : > { %v2514_v24 = vpack.c.bf16 %v1818_v48, %v1818_v48  ;;  %v1745_v25 = vmul.f32 %v3093_v35, %v1674_v13  ;;  %vm1542_vm5 = vcmp.gt.f32.partialorder %v1478_v58, 0.0  ;;  %v1613_v15 = vmul.f32 %v3077_v19, %v1478_v58  ;;  %v1372_v13 = vld [vmem:[#allocation2 + $0x198] sm:$0xff] }
 0x129   : > { %v2546_v17 = vpack.c.bf16 %v1850_v7, %v1850_v7  ;;  %v1706_v18 = vsel %vm1571_vm3, %v1507_v33, %v1642_v14  ;;  %v1510_v43 = vadd.f32 %v3068_v9, %v1439_v59  ;;  %v1476_v39 = vadd.f32 %v3068_v9, %v1405_v8  ;;  %v1338_v14 = vld [vmem:[#allocation2 + $0x88] sm:$0xff] }
 0x12a   : > { %2139 = vst.msk [vmem:[%s3135_s8 + $0x38] sm:$0xf] %vm2124_vm4, %v2514_v24  ;;  %v1816_v40 = vadd.f32 %v3109_v46, %v1745_v25  ;;  %v1777_v0 = vmul.f32 %v3093_v35, %v1706_v18  ;;  %v1677_v23 = vsel %vm1542_vm5, %v1478_v58, %v1613_v15  ;;  %v1437_v26 = vmul.f32 %v3061_v1, %v1366_v12  ;;  %v3456_v12 = vpop.f32.mrf.mxu0  ;;  %v3458_v24 = vpop.f32.mrf.mxu1 }
 0x12b   : > { %2171 = vst.msk [vmem:[%s3135_s8 + $0xb8] sm:$0xf] %vm2124_vm4, %v2546_v17  ;;  %v1748_v29 = vmul.f32 %v3093_v35, %v1677_v23  ;;  %vm1574_vm6 = vcmp.gt.f32.partialorder %v1510_v43, 0.0  ;;  %v1645_v44 = vmul.f32 %v3077_v19, %v1510_v43  ;;  %vm1540_vm7 = vcmp.gt.f32.partialorder %v1476_v39, 0.0 }
 0x12c   : > { %v2512_v2 = vpack.c.bf16 %v1816_v40, %v1816_v40  ;;  %v1848_v22 = vadd.f32 %v3109_v46, %v1777_v0  ;;  %v1611_v53 = vmul.f32 %v3077_v19, %v1476_v39  ;;  %v1508_v30 = vadd.f32 %v3068_v9, %v1437_v26  ;;  %v3471_v0 = vld [vmem:[%s3764_s2] ss:$0 sm:$0xff] }
 0x12d   : > { %v1819_v54 = vadd.f32 %v3109_v46, %v1748_v29  ;;  %v1709_v38 = vsel %vm1574_vm6, %v1510_v43, %v1645_v44  ;;  %v1410_v62 = vmul.f32 %v3061_v1, %v1339_v27  ;;  %v1442_v41 = vmul.f32 %v3061_v1, %v1371_v28  ;;  %v1370_v27 = vld [vmem:[#allocation2 + $0x188] sm:$0xff]  ;;  %v1343_v28 = vld [vmem:[#allocation2 + $0xb0] sm:$0xff] }
 0x12e   : > { %2137 = vst.msk [vmem:[%s3135_s8 + $0x30] sm:$0xf] %vm2124_vm4, %v2512_v2  ;;  %v2544_v49 = vpack.c.bf16 %v1848_v22, %v1848_v22  ;;  %v1780_v50 = vmul.f32 %v3093_v35, %v1709_v38  ;;  %v1675_v63 = vsel %vm1540_vm7, %v1476_v39, %v1611_v53  ;;  %vm1572_vm8 = vcmp.gt.f32.partialorder %v1508_v30, 0.0  ;;  %v3478_v2 = vpop.f32.mrf.mxu0  ;;  %v3480_v22 = vpop.f32.mrf.mxu1  ;;  %v3487_v38 = vld [vmem:[%s3765_s3] ss:$0 sm:$0xff] }
 0x12f   : > { %v2515_v51 = vpack.c.bf16 %v1819_v54, %v1819_v54  ;;  %v1746_v52 = vmul.f32 %v3093_v35, %v1675_v63  ;;  %v1643_v10 = vmul.f32 %v3077_v19, %v1508_v30  ;;  %v1481_v55 = vadd.f32 %v3068_v9, %v1410_v62  ;;  %v3502_v63 = vld [vmem:[%s3766_s4] ss:$0 sm:$0xff] }
 0x130   : > { %2169 = vst.msk [vmem:[%s3135_s8 + $0xb0] sm:$0xf] %vm2124_vm4, %v2544_v49  ;;  %v1851_v56 = vadd.f32 %v3109_v46, %v1780_v50  ;;  %v1513_v11 = vadd.f32 %v3068_v9, %v1442_v41  ;;  %v1408_v20 = vmul.f32 %v3061_v1, %v1337_v42  ;;  %v1440_v57 = vmul.f32 %v3061_v1, %v1369_v45 }
 0x131   : > { %2140 = vst.msk [vmem:[%s3135_s8 + $0x3c] sm:$0xf] %vm2124_vm4, %v2515_v51  ;;  %v1817_v61 = vadd.f32 %v3109_v46, %v1746_v52  ;;  %v1707_v32 = vsel %vm1572_vm8, %v1508_v30, %v1643_v10  ;;  %vm1545_vm9 = vcmp.gt.f32.partialorder %v1481_v55, 0.0  ;;  %v1616_v31 = vmul.f32 %v3077_v19, %v1481_v55  ;;  %v1375_v52 = vld [vmem:[#allocation2 + $0x1b0] sm:$0xff] }
 0x132   : > { %v2547_v47 = vpack.c.bf16 %v1851_v56, %v1851_v56  ;;  %v1778_v3 = vmul.f32 %v3093_v35, %v1707_v32  ;;  %vm1577_vm10 = vcmp.gt.f32.partialorder %v1513_v11, 0.0  ;;  %v1648_v4 = vmul.f32 %v3077_v19, %v1513_v11 }
 0x133   : > { %v2513_v5 = vpack.c.bf16 %v1817_v61, %v1817_v61  ;;  %v1680_v6 = vsel %vm1545_vm9, %v1481_v55, %v1616_v31  ;;  %v1479_v33 = vadd.f32 %v3068_v9, %v1408_v20  ;;  %v1511_v48 = vadd.f32 %v3068_v9, %v1440_v57  ;;  %v3509_v20 = vpop.f32.mrf.mxu1 }
 0x134   : > { %2172 = vst.msk [vmem:[%s3135_s8 + $0xbc] sm:$0xf] %vm2124_vm4, %v2547_v47  ;;  %v1849_v58 = vadd.f32 %v3109_v46, %v1778_v3  ;;  %v1751_v59 = vmul.f32 %v3093_v35, %v1680_v6  ;;  %v1712_v8 = vsel %vm1577_vm10, %v1513_v11, %v1648_v4  ;;  %v1411_v7 = vmul.f32 %v3061_v1, %v1340_v34  ;;  %v3507_v11 = vpop.f32.mrf.mxu0  ;;  %v1373_v6 = vld [vmem:[#allocation2 + $0x1a0] sm:$0xff] }
 0x135   : > { %2138 = vst.msk [vmem:[%s3135_s8 + $0x34] sm:$0xf] %vm2124_vm4, %v2513_v5  ;;  %v1783_v25 = vmul.f32 %v3093_v35, %v1712_v8  ;;  %vm1543_vm11 = vcmp.gt.f32.partialorder %v1479_v33, 0.0  ;;  %v1614_v15 = vmul.f32 %v3077_v19, %v1479_v33  ;;  %vm1575_vm12 = vcmp.gt.f32.partialorder %v1511_v48, 0.0  ;;  %v1341_v5 = vld [vmem:[#allocation2 + $0xa0] sm:$0xff] }
 0x136   : > { %v2545_v17 = vpack.c.bf16 %v1849_v58, %v1849_v58  ;;  %v1822_v18 = vadd.f32 %v3109_v46, %v1751_v59  ;;  %v1646_v1 = vmul.f32 %v3077_v19, %v1511_v48  ;;  %v1482_v43 = vadd.f32 %v3068_v9, %v1411_v7 }
 0x137   : > { %v1854_v39 = vadd.f32 %v3109_v46, %v1783_v25  ;;  %v1678_v40 = vsel %vm1543_vm11, %v1479_v33, %v1614_v15  ;;  %v1443_v23 = vmul.f32 %v3471_v0, %v1372_v13  ;;  %v1409_v26 = vmul.f32 %v3471_v0, %v1338_v14  ;;  %v3523_v33 = vld [vmem:[%s3767_s5] ss:$0 sm:$0xff]  ;;  %v3530_v13 = vpop.f32.mrf.mxu0  ;;  %v3532_v14 = vpop.f32.mrf.mxu1 }
 0x138   : > { %2170 = vst.msk [vmem:[%s3135_s8 + $0xb4] sm:$0xf] %vm2124_vm4, %v2545_v17  ;;  %v2518_v29 = vpack.c.bf16 %v1822_v18, %v1822_v18  ;;  %v1749_v9 = vmul.f32 %v3093_v35, %v1678_v40  ;;  %v1710_v44 = vsel %vm1575_vm12, %v1511_v48, %v1646_v1  ;;  %vm1546_vm13 = vcmp.gt.f32.partialorder %v1482_v43, 0.0  ;;  %v1344_v1 = vld [vmem:[#allocation2 + $0xb8] sm:$0xff] }
 0x139   : > { %v2550_v53 = vpack.c.bf16 %v1854_v39, %v1854_v39  ;;  %v1781_v30 = vmul.f32 %v3093_v35, %v1710_v44  ;;  %v1617_v54 = vmul.f32 %v3077_v19, %v1482_v43  ;;  %v1514_v62 = vadd.f32 %v3487_v38, %v1443_v23 }
 0x13a   : > { %2143 = vst.msk [vmem:[%s3135_s8 + $0x48] sm:$0xf] %vm2124_vm4, %v2518_v29  ;;  %v1820_v41 = vadd.f32 %v3109_v46, %v1749_v9  ;;  %v1480_v42 = vadd.f32 %v3487_v38, %v1409_v26  ;;  %v1441_v45 = vmul.f32 %v3471_v0, %v1370_v27  ;;  %v1414_v49 = vmul.f32 %v3471_v0, %v1343_v28  ;;  %v3549_v29 = vld [vmem:[%s3768_s6] ss:$0 sm:$0xff] }
 0x13b   : > { %2175 = vst.msk [vmem:[%s3135_s8 + $0xc8] sm:$0xf] %vm2124_vm4, %v2550_v53  ;;  %v1852_v19 = vadd.f32 %v3109_v46, %v1781_v30  ;;  %v1681_v50 = vsel %vm1546_vm13, %v1482_v43, %v1617_v54  ;;  %vm1578_vm14 = vcmp.gt.f32.partialorder %v1514_v62, 0.0  ;;  %v1649_v51 = vmul.f32 %v3502_v63, %v1514_v62  ;;  %v548_v43 = vld [vmem:[#allocation2 + $0x1b8] sm:$0xff]  ;;  %v514_v54 = vld [vmem:[#allocation2 + $0xa8] sm:$0xff] }
 0x13c   : > { %v2516_v10 = vpack.c.bf16 %v1820_v41, %v1820_v41  ;;  %v1752_v55 = vmul.f32 %v3093_v35, %v1681_v50  ;;  %vm1544_vm15 = vcmp.gt.f32.partialorder %v1480_v42, 0.0  ;;  %v1615_v56 = vmul.f32 %v3502_v63, %v1480_v42  ;;  %v3557_v41 = vpop.f32.mrf.mxu1 }
 0x13d   : > { %v2548_v57 = vpack.c.bf16 %v1852_v19, %v1852_v19  ;;  %v1713_v61 = vsel %vm1578_vm14, %v1514_v62, %v1649_v51  ;;  %v1512_v32 = vadd.f32 %v3487_v38, %v1441_v45  ;;  %v1485_v31 = vadd.f32 %v3487_v38, %v1414_v49  ;;  %v3555_v62 = vpop.f32.mrf.mxu0  ;;  %v546_v19 = vld [vmem:[#allocation2 + $0x1a8] sm:$0xff] }
 0x13e   : > { %2141 = vst.msk [vmem:[%s3135_s8 + $0x40] sm:$0xf] %vm2124_vm4, %v2516_v10  ;;  %v1823_v34 = vadd.f32 %v3109_v46, %v1752_v55  ;;  %v1784_v47 = vmul.f32 %v3093_v35, %v1713_v61  ;;  %v1679_v3 = vsel %vm1544_vm15, %v1480_v42, %v1615_v56  ;;  %v1446_v4 = vmul.f32 %v3471_v0, %v1375_v52  ;;  %v519_v52 = vld [vmem:[#allocation2 + $0xd0] sm:$0xff] }
 0x13f   : > { %2173 = vst.msk [vmem:[%s3135_s8 + $0xc0] sm:$0xf] %vm2124_vm4, %v2548_v57  ;;  %v1750_v48 = vmul.f32 %v3523_v33, %v1679_v3  ;;  %vm1576_vm0 = vcmp.gt.f32.partialorder %v1512_v32, 0.0  ;;  %v1647_v58 = vmul.f32 %v3502_v63, %v1512_v32  ;;  %vm1549_vm1 = vcmp.gt.f32.partialorder %v1485_v31, 0.0  ;;  %v551_v61 = vld [vmem:[#allocation2 + $0x1d0] sm:$0xff] }
 0x140   : > { %v2519_v35 = vpack.c.bf16 %v1823_v34, %v1823_v34  ;;  %v1855_v59 = vadd.f32 %v3109_v46, %v1784_v47  ;;  %v1620_v8 = vmul.f32 %v3502_v63, %v1485_v31  ;;  %v1517_v7 = vadd.f32 %v3487_v38, %v1446_v4  ;;  %v549_v4 = vld [vmem:[#allocation2 + $0x1c0] sm:$0xff] }
 0x141   : > { %v1821_v25 = vadd.f32 %v3109_v46, %v1750_v48  ;;  %v1711_v15 = vsel %vm1576_vm0, %v1512_v32, %v1647_v58  ;;  %v1412_v17 = vmul.f32 %v3471_v0, %v1341_v5  ;;  %v1444_v18 = vmul.f32 %v3471_v0, %v1373_v6  ;;  %v517_v32 = vld [vmem:[#allocation2 + $0xc0] sm:$0xff]  ;;  %v520_v5 = vld [vmem:[#allocation2 + $0xd8] sm:$0xff]  ;;  %v2633_v6 = vpop.f32.mrf.mxu0  ;;  %v2665_v48 = vpop.f32.mrf.mxu1 }
 0x142   : > { %2144 = vst.msk [vmem:[%s3135_s8 + $0x4c] sm:$0xf] %vm2124_vm4, %v2519_v35  ;;  %v2551_v39 = vpack.c.bf16 %v1855_v59, %v1855_v59  ;;  %v1782_v40 = vmul.f32 %v3523_v33, %v1711_v15  ;;  %v1684_v23 = vsel %vm1549_vm1, %v1485_v31, %v1620_v8  ;;  %vm1581_vm3 = vcmp.gt.f32.partialorder %v1517_v7, 0.0  ;;  %v552_v59 = vld [vmem:[#allocation2 + $0x1d8] sm:$0xff]  ;;  %v518_v8 = vld [vmem:[#allocation2 + $0xc8] sm:$0xff] }
 0x143   : > { %v2517_v26 = vpack.c.bf16 %v1821_v25, %v1821_v25  ;;  %v1755_v27 = vmul.f32 %v3523_v33, %v1684_v23  ;;  %v1652_v46 = vmul.f32 %v3502_v63, %v1517_v7  ;;  %v1483_v28 = vadd.f32 %v3487_v38, %v1412_v17  ;;  %v550_v17 = vld [vmem:[#allocation2 + $0x1c8] sm:$0xff]  ;;  %v521_v23 = vld [vmem:[#allocation2 + $0xe0] sm:$0xff] }
 0x144   : > { %2176 = vst.msk [vmem:[%s3135_s8 + $0xcc] sm:$0xf] %vm2124_vm4, %v2551_v39  ;;  %v1853_v9 = vadd.f32 %v3549_v29, %v1782_v40  ;;  %v1515_v44 = vadd.f32 %v3487_v38, %v1444_v18  ;;  %v1415_v53 = vmul.f32 %v3471_v0, %v1344_v1  ;;  %v1244_v30 = vadd.f32 %v3403_v16, %v548_v43  ;;  %v523_v18 = vld [vmem:[#allocation2 + $0xf0] sm:$0xff] }
 0x145   : > { %2142 = vst.msk [vmem:[%s3135_s8 + $0x44] sm:$0xf] %vm2124_vm4, %v2517_v26  ;;  %v1826_v42 = vadd.f32 %v3549_v29, %v1755_v27  ;;  %v1716_v45 = vsel %vm1581_vm3, %v1517_v7, %v1652_v46  ;;  %vm1547_vm5 = vcmp.gt.f32.partialorder %v1483_v28, 0.0  ;;  %v1618_v49 = vmul.f32 %v3502_v63, %v1483_v28  ;;  %v555_v1 = vld [vmem:[#allocation2 + $0x1f0] sm:$0xff]  ;;  %v553_v26 = vld [vmem:[#allocation2 + $0x1e0] sm:$0xff]  ;;  %v524_v27 = vld [vmem:[#allocation2 + $0xf8] sm:$0xff] }
 0x146   : > { %v2549_v50 = vpack.c.bf16 %v1853_v9, %v1853_v9  ;;  %v1787_v51 = vmul.f32 %v3523_v33, %v1716_v45  ;;  %vm1579_vm6 = vcmp.gt.f32.partialorder %v1515_v44, 0.0  ;;  %v1650_v16 = vmul.f32 %v3502_v63, %v1515_v44  ;;  %1309 = vst.msk [vmem:[#allocation2 + $0x1b8] sm:$0xff] %vm428_vm2, %v1244_v30  ;;  %v522_v9 = vld [vmem:[#allocation2 + $0xe8] sm:$0xff] }
 0x147   : > { %v2522_v10 = vpack.c.bf16 %v1826_v42, %v1826_v42  ;;  %v1682_v55 = vsel %vm1547_vm5, %v1483_v28, %v1618_v49  ;;  %v1486_v56 = vadd.f32 %v3487_v38, %v1415_v53  ;;  %v1210_v57 = vadd.f32 %v3419_v36, %v514_v54  ;;  %v1177_v53 = vpop.f32.mrf.mxu1 }
 0x148   : > { %2174 = vst.msk [vmem:[%s3135_s8 + $0xc4] sm:$0xf] %vm2124_vm4, %v2549_v50  ;;  %v1858_v31 = vadd.f32 %v3549_v29, %v1787_v51  ;;  %v1753_v34 = vmul.f32 %v3523_v33, %v1682_v55  ;;  %v1714_v47 = vsel %vm1579_vm6, %v1515_v44, %v1650_v16  ;;  %v1242_v3 = vadd.f32 %v3421_v37, %v546_v19  ;;  %v554_v44 = vld [vmem:[#allocation2 + $0x1e8] sm:$0xff] }
 0x149   : > { %2147 = vst.msk [vmem:[%s3135_s8 + $0x58] sm:$0xf] %vm2124_vm4, %v2522_v10  ;;  %v1785_v58 = vmul.f32 %v3523_v33, %v1714_v47  ;;  %vm1550_vm7 = vcmp.gt.f32.partialorder %v1486_v56, 0.0  ;;  %v1621_v36 = vmul.f32 %v3502_v63, %v1486_v56  ;;  %v1215_v35 = vadd.f32 %v3439_v21, %v519_v52 }
 0x14a   : > { %1275 = vst.msk [vmem:[#allocation2 + $0xa8] sm:$0xff] %vm428_vm2, %v1210_v57  ;;  %v2554_v7 = vpack.c.bf16 %v1858_v31, %v1858_v31  ;;  %v1824_v37 = vadd.f32 %v3549_v29, %v1753_v34  ;;  %1307 = vst.msk [vmem:[#allocation2 + $0x1a8] sm:$0xff] %vm428_vm2, %v1242_v3  ;;  %v1247_v25 = vadd.f32 %v3441_v60, %v551_v61 }
 0x14b   : > { %v1213_v15 = vadd.f32 %v3456_v12, %v517_v32  ;;  %v1856_v43 = vadd.f32 %v3549_v29, %v1785_v58  ;;  %v1685_v39 = vsel %vm1550_vm7, %v1486_v56, %v1621_v36  ;;  %1280 = vst.msk [vmem:[#allocation2 + $0xd0] sm:$0xff] %vm428_vm2, %v1215_v35  ;;  %v1245_v21 = vadd.f32 %v3458_v24, %v549_v4  ;;  %v556_v24 = vld [vmem:[#allocation2 + $0x1f8] sm:$0xff] }
 0x14c   : > { %v1216_v40 = vadd.f32 %v3478_v2, %v520_v5  ;;  %2179 = vst.msk [vmem:[%s3135_s8 + $0xd8] sm:$0xf] %vm2124_vm4, %v2554_v7  ;;  %v2520_v60 = vpack.c.bf16 %v1824_v37, %v1824_v37  ;;  %v1756_v12 = vmul.f32 %v3523_v33, %v1685_v39  ;;  %v1248_v46 = vadd.f32 %v3480_v22, %v552_v59  ;;  %v1049_v2 = vpop.f32.mrf.mxu0 }
 0x14d   : > { %1312 = vst.msk [vmem:[#allocation2 + $0x1d0] sm:$0xff] %vm428_vm2, %v1247_v25  ;;  %1278 = vst.msk [vmem:[#allocation2 + $0xc0] sm:$0xff] %vm428_vm2, %v1213_v15  ;;  %v1214_v28 = vadd.f32 %v3507_v11, %v518_v8  ;;  %v2552_v30 = vpack.c.bf16 %v1856_v43, %v1856_v43  ;;  %v1376_v54 = vld [vmem:[#allocation2 + $0x1b8] sm:$0xff]  ;;  %v1246_v42 = vadd.f32 %v3509_v20, %v550_v17 }
 0x14e   : > { %1310 = vst.msk [vmem:[#allocation2 + $0x1c0] sm:$0xff] %vm428_vm2, %v1245_v21  ;;  %1281 = vst.msk [vmem:[#allocation2 + $0xd8] sm:$0xff] %vm428_vm2, %v1216_v40  ;;  %v1219_v45 = vadd.f32 %v3530_v13, %v523_v18  ;;  %v1251_v22 = vadd.f32 %v3532_v14, %v555_v1  ;;  %v1827_v11 = vadd.f32 %v3549_v29, %v1756_v12 }
 0x14f   : > { %2145 = vst.msk [vmem:[%s3135_s8 + $0x50] sm:$0xf] %vm2124_vm4, %v2520_v60  ;;  %v1447_v49 = vmul.f32 %v3471_v0, %v1376_v54  ;;  %v1217_v19 = vadd.f32 %v3555_v62, %v521_v23  ;;  %v1249_v50 = vadd.f32 %v3557_v41, %v553_v26  ;;  %2177 = vst.msk [vmem:[%s3135_s8 + $0xd0] sm:$0xf] %vm2124_vm4, %v2552_v30 }
 0x150   : > { %1313 = vst.msk [vmem:[#allocation2 + $0x1d8] sm:$0xff] %vm428_vm2, %v1248_v46  ;;  %1279 = vst.msk [vmem:[#allocation2 + $0xc8] sm:$0xff] %vm428_vm2, %v1214_v28  ;;  %v1220_v20 = vadd.f32 %v2633_v6, %v524_v27  ;;  %v1252_v13 = vadd.f32 %v2665_v48, %v556_v24  ;;  %v1218_v14 = vadd.f32 %v1049_v2, %v522_v9 }
 0x151   : > { %1311 = vst.msk [vmem:[#allocation2 + $0x1c8] sm:$0xff] %vm428_vm2, %v1246_v42  ;;  %1284 = vst.msk [vmem:[#allocation2 + $0xf0] sm:$0xff] %vm428_vm2, %v1219_v45  ;;  %v1250_v51 = vadd.f32 %v1177_v53, %v554_v44  ;;  %v2523_v16 = vpack.c.bf16 %v1827_v11, %v1827_v11  ;;  %v1518_v52 = vadd.f32 %v3487_v38, %v1447_v49  ;;  %v1342_v10 = vld [vmem:[#allocation2 + $0xa8] sm:$0xff] }
 0x152   : > { %1316 = vst.msk [vmem:[#allocation2 + $0x1f0] sm:$0xff] %vm428_vm2, %v1251_v22  ;;  %1282 = vst.msk [vmem:[#allocation2 + $0xe0] sm:$0xff] %vm428_vm2, %v1217_v19  ;;  %v1413_v62 = vmul.f32 %v3471_v0, %v1342_v10  ;;  %v1374_v41 = vld [vmem:[#allocation2 + $0x1a8] sm:$0xff]  ;;  %v1347_v57 = vld [vmem:[#allocation2 + $0xd0] sm:$0xff] }
 0x153   : > { %1314 = vst.msk [vmem:[#allocation2 + $0x1e0] sm:$0xff] %vm428_vm2, %v1249_v50  ;;  %1285 = vst.msk [vmem:[#allocation2 + $0xf8] sm:$0xff] %vm428_vm2, %v1220_v20  ;;  %vm1582_vm8 = vcmp.gt.f32.partialorder %v1518_v52, 0.0  ;;  %v1653_v55 = vmul.f32 %v3502_v63, %v1518_v52  ;;  %v1445_v56 = vmul.f32 %v3471_v0, %v1374_v41  ;;  %v1418_v32 = vmul.f32 %v3471_v0, %v1347_v57 }
 0x154   : > { %1317 = vst.msk [vmem:[#allocation2 + $0x1f8] sm:$0xff] %vm428_vm2, %v1252_v13  ;;  %1283 = vst.msk [vmem:[#allocation2 + $0xe8] sm:$0xff] %vm428_vm2, %v1218_v14  ;;  %v1484_v61 = vadd.f32 %v3487_v38, %v1413_v62  ;;  %v1379_v31 = vld [vmem:[#allocation2 + $0x1d0] sm:$0xff]  ;;  %v1345_v34 = vld [vmem:[#allocation2 + $0xc0] sm:$0xff] }
 0x155   : > { %1315 = vst.msk [vmem:[#allocation2 + $0x1e8] sm:$0xff] %vm428_vm2, %v1250_v51  ;;  %v1717_v47 = vsel %vm1582_vm8, %v1518_v52, %v1653_v55  ;;  %v1516_v3 = vadd.f32 %v3487_v38, %v1445_v56  ;;  %v1450_v4 = vmul.f32 %v3471_v0, %v1379_v31  ;;  %v1416_v5 = vmul.f32 %v3471_v0, %v1345_v34  ;;  %v1377_v18 = vld [vmem:[#allocation2 + $0x1c0] sm:$0xff]  ;;  %v1348_v1 = vld [vmem:[#allocation2 + $0xd8] sm:$0xff] }
 0x156   : > { %2148 = vst.msk [vmem:[%s3135_s8 + $0x5c] sm:$0xf] %vm2124_vm4, %v2523_v16  ;;  %v1788_v6 = vmul.f32 %v3523_v33, %v1717_v47  ;;  %vm1548_vm2 = vcmp.gt.f32.partialorder %v1484_v61, 0.0  ;;  %v1619_v48 = vmul.f32 %v3502_v63, %v1484_v61  ;;  %v1489_v58 = vadd.f32 %v3487_v38, %v1418_v32 }
 0x157   : > { %vm1580_vm9 = vcmp.gt.f32.partialorder %v1516_v3, 0.0  ;;  %v1651_v36 = vmul.f32 %v3502_v63, %v1516_v3  ;;  %v1521_v35 = vadd.f32 %v3487_v38, %v1450_v4  ;;  %v1487_v59 = vadd.f32 %v3487_v38, %v1416_v5  ;;  %v1380_v40 = vld [vmem:[#allocation2 + $0x1d8] sm:$0xff]  ;;  %v1346_v9 = vld [vmem:[#allocation2 + $0xc8] sm:$0xff] }
 0x158   : > { %v1859_v8 = vadd.f32 %v3549_v29, %v1788_v6  ;;  %v1683_v7 = vsel %vm1548_vm2, %v1484_v61, %v1619_v48  ;;  %vm1553_vm10 = vcmp.gt.f32.partialorder %v1489_v58, 0.0  ;;  %v1624_v37 = vmul.f32 %v3502_v63, %v1489_v58  ;;  %v1378_v20 = vld [vmem:[#allocation2 + $0x1c8] sm:$0xff]  ;;  %v1351_v16 = vld [vmem:[#allocation2 + $0xf0] sm:$0xff] }
 0x159   : > { %v1754_v25 = vmul.f32 %v3523_v33, %v1683_v7  ;;  %v1715_v15 = vsel %vm1580_vm9, %v1516_v3, %v1651_v36  ;;  %vm1585_vm11 = vcmp.gt.f32.partialorder %v1521_v35, 0.0  ;;  %v1656_v17 = vmul.f32 %v3502_v63, %v1521_v35  ;;  %v1383_v57 = vld [vmem:[#allocation2 + $0x1f0] sm:$0xff]  ;;  %v1349_v47 = vld [vmem:[#allocation2 + $0xe0] sm:$0xff] }
 0x15a   : > { %v2555_v43 = vpack.c.bf16 %v1859_v8, %v1859_v8  ;;  %v1786_v39 = vmul.f32 %v3523_v33, %v1715_v15  ;;  %v1688_v21 = vsel %vm1553_vm10, %v1489_v58, %v1624_v37  ;;  %vm1551_vm12 = vcmp.gt.f32.partialorder %v1487_v59, 0.0 }
 0x15b   : > { %v1825_v23 = vadd.f32 %v3549_v29, %v1754_v25  ;;  %v1759_v26 = vmul.f32 %v3523_v33, %v1688_v21  ;;  %v1720_v27 = vsel %vm1585_vm11, %v1521_v35, %v1656_v17  ;;  %v1622_v60 = vmul.f32 %v3502_v63, %v1487_v59  ;;  %v1381_v17 = vld [vmem:[#allocation2 + $0x1e0] sm:$0xff] }
 0x15c   : > { %2180 = vst.msk [vmem:[%s3135_s8 + $0xdc] sm:$0xf] %vm2124_vm4, %v2555_v43  ;;  %v1857_v12 = vadd.f32 %v3549_v29, %v1786_v39  ;;  %v1791_v46 = vmul.f32 %v3523_v33, %v1720_v27  ;;  %v1448_v28 = vmul.f32 %v3471_v0, %v1377_v18  ;;  %v1419_v24 = vmul.f32 %v3471_v0, %v1348_v1  ;;  %v1352_v18 = vld [vmem:[#allocation2 + $0xf8] sm:$0xff] }
 0x15d   : > { %v2521_v2 = vpack.c.bf16 %v1825_v23, %v1825_v23  ;;  %v1830_v44 = vadd.f32 %v3549_v29, %v1759_v26  ;;  %v1686_v53 = vsel %vm1551_vm12, %v1487_v59, %v1622_v60  ;;  %v1451_v30 = vmul.f32 %v3471_v0, %v1380_v40 }
 0x15e   : > { %v2553_v54 = vpack.c.bf16 %v1857_v12, %v1857_v12  ;;  %v1862_v42 = vadd.f32 %v3549_v29, %v1791_v46  ;;  %v1757_v45 = vmul.f32 %v3523_v33, %v1686_v53  ;;  %v1519_v22 = vadd.f32 %v3487_v38, %v1448_v28  ;;  %v1384_v28 = vld [vmem:[#allocation2 + $0x1f8] sm:$0xff] }
 0x15f   : > { %2146 = vst.msk [vmem:[%s3135_s8 + $0x54] sm:$0xf] %vm2124_vm4, %v2521_v2  ;;  %v2526_v11 = vpack.c.bf16 %v1830_v44, %v1830_v44  ;;  %v1490_v49 = vadd.f32 %v3487_v38, %v1419_v24  ;;  %v1522_v19 = vadd.f32 %v3487_v38, %v1451_v30  ;;  %v1417_v50 = vmul.f32 %v3471_v0, %v1346_v9 }
 0x160   : > { %2178 = vst.msk [vmem:[%s3135_s8 + $0xd4] sm:$0xf] %vm2124_vm4, %v2553_v54  ;;  %v2558_v13 = vpack.c.bf16 %v1862_v42, %v1862_v42  ;;  %v1828_v14 = vadd.f32 %v3549_v29, %v1757_v45  ;;  %vm1583_vm13 = vcmp.gt.f32.partialorder %v1519_v22, 0.0  ;;  %v1654_v51 = vmul.f32 %v3502_v63, %v1519_v22 }
 0x161   : > { %2151 = vst.msk [vmem:[%s3135_s8 + $0x68] sm:$0xf] %vm2124_vm4, %v2526_v11  ;;  %vm1554_vm14 = vcmp.gt.f32.partialorder %v1490_v49, 0.0  ;;  %v1625_v52 = vmul.f32 %v3502_v63, %v1490_v49  ;;  %vm1586_vm15 = vcmp.gt.f32.partialorder %v1522_v19, 0.0  ;;  %v1657_v10 = vmul.f32 %v3502_v63, %v1522_v19  ;;  %v1350_v11 = vld [vmem:[#allocation2 + $0xe8] sm:$0xff] }
 0x162   : > { %2183 = vst.msk [vmem:[%s3135_s8 + $0xe8] sm:$0xf] %vm2124_vm4, %v2558_v13  ;;  %v2524_v62 = vpack.c.bf16 %v1828_v14, %v1828_v14  ;;  %v1718_v41 = vsel %vm1583_vm13, %v1519_v22, %v1654_v51  ;;  %v1488_v55 = vadd.f32 %v3487_v38, %v1417_v50  ;;  %v1449_v56 = vmul.f32 %v3471_v0, %v1378_v20  ;;  %v1382_v20 = vld [vmem:[#allocation2 + $0x1e8] sm:$0xff] }
 0x163   : > { %v1789_v61 = vmul.f32 %v3523_v33, %v1718_v41  ;;  %v1689_v32 = vsel %vm1554_vm14, %v1490_v49, %v1625_v52  ;;  %v1721_v31 = vsel %vm1586_vm15, %v1522_v19, %v1657_v10  ;;  %v1422_v34 = vmul.f32 %v3471_v0, %v1351_v16 }
 0x164   : > { %2149 = vst.msk [vmem:[%s3135_s8 + $0x60] sm:$0xf] %vm2124_vm4, %v2524_v62  ;;  %v1760_v3 = vmul.f32 %v3523_v33, %v1689_v32  ;;  %v1792_v4 = vmul.f32 %v3523_v33, %v1721_v31  ;;  %vm1552_vm0 = vcmp.gt.f32.partialorder %v1488_v55, 0.0  ;;  %v1623_v5 = vmul.f32 %v3502_v63, %v1488_v55 }
 0x165   : > { %v1860_v6 = vadd.f32 %v3549_v29, %v1789_v61  ;;  %v1520_v48 = vadd.f32 %v3487_v38, %v1449_v56  ;;  %v1493_v58 = vadd.f32 %v3487_v38, %v1422_v34  ;;  %v1454_v36 = vmul.f32 %v3471_v0, %v1383_v57 }
 0x166   : > { %v1831_v35 = vadd.f32 %v3549_v29, %v1760_v3  ;;  %v1863_v59 = vadd.f32 %v3549_v29, %v1792_v4  ;;  %v1687_v8 = vsel %vm1552_vm0, %v1488_v55, %v1623_v5  ;;  %v1420_v7 = vmul.f32 %v3471_v0, %v1349_v47 }
 0x167   : > { %v2556_v37 = vpack.c.bf16 %v1860_v6, %v1860_v6  ;;  %v1758_v25 = vmul.f32 %v3523_v33, %v1687_v8  ;;  %vm1584_vm1 = vcmp.gt.f32.partialorder %v1520_v48, 0.0  ;;  %v1655_v15 = vmul.f32 %v3502_v63, %v1520_v48 }
 0x168   : > { %v2527_v1 = vpack.c.bf16 %v1831_v35, %v1831_v35  ;;  %v2559_v43 = vpack.c.bf16 %v1863_v59, %v1863_v59  ;;  %vm1557_vm3 = vcmp.gt.f32.partialorder %v1493_v58, 0.0  ;;  %v1628_v39 = vmul.f32 %v3502_v63, %v1493_v58 }
 0x169   : > { %2181 = vst.msk [vmem:[%s3135_s8 + $0xe0] sm:$0xf] %vm2124_vm4, %v2556_v37  ;;  %v1829_v21 = vadd.f32 %v3549_v29, %v1758_v25  ;;  %v1719_v40 = vsel %vm1584_vm1, %v1520_v48, %v1655_v15  ;;  %v1525_v23 = vadd.f32 %v3487_v38, %v1454_v36  ;;  %v1491_v26 = vadd.f32 %v3487_v38, %v1420_v7 }
 0x16a   : > { %2152 = vst.msk [vmem:[%s3135_s8 + $0x6c] sm:$0xf] %vm2124_vm4, %v2527_v1  ;;  %2184 = vst.msk [vmem:[%s3135_s8 + $0xec] sm:$0xf] %vm2124_vm4, %v2559_v43  ;;  %v1790_v27 = vmul.f32 %v3523_v33, %v1719_v40  ;;  %v1692_v60 = vsel %vm1557_vm3, %v1493_v58, %v1628_v39  ;;  %v1452_v12 = vmul.f32 %v3471_v0, %v1381_v17 }
 0x16b   : > { %v1423_v46 = vmul.f32 %v3471_v0, %v1352_v18  ;;  %v2525_v24 = vpack.c.bf16 %v1829_v21, %v1829_v21  ;;  %v1763_v9 = vmul.f32 %v3523_v33, %v1692_v60  ;;  %vm1589_vm5 = vcmp.gt.f32.partialorder %v1525_v23, 0.0 }
 0x16c   : > { %v1660_v2 = vmul.f32 %v3502_v63, %v1525_v23  ;;  %v1861_v44 = vadd.f32 %v3549_v29, %v1790_v27  ;;  %vm1555_vm6 = vcmp.gt.f32.partialorder %v1491_v26, 0.0  ;;  %v1626_v53 = vmul.f32 %v3502_v63, %v1491_v26 }
 0x16d   : > { %v1523_v30 = vadd.f32 %v3487_v38, %v1452_v12  ;;  %2150 = vst.msk [vmem:[%s3135_s8 + $0x64] sm:$0xf] %vm2124_vm4, %v2525_v24  ;;  %v1834_v54 = vadd.f32 %v3549_v29, %v1763_v9  ;;  %v1494_v45 = vadd.f32 %v3487_v38, %v1423_v46  ;;  %v1455_v22 = vmul.f32 %v3471_v0, %v1384_v28 }
 0x16e   : > { %v1724_v42 = vsel %vm1589_vm5, %v1525_v23, %v1660_v2  ;;  %v2557_v49 = vpack.c.bf16 %v1861_v44, %v1861_v44  ;;  %v1690_v50 = vsel %vm1555_vm6, %v1491_v26, %v1626_v53  ;;  %v1421_v62 = vmul.f32 %v3471_v0, %v1350_v11 }
 0x16f   : > { %v1795_v19 = vmul.f32 %v3523_v33, %v1724_v42  ;;  %vm1587_vm7 = vcmp.gt.f32.partialorder %v1523_v30, 0.0  ;;  %v2530_v13 = vpack.c.bf16 %v1834_v54, %v1834_v54  ;;  %v1761_v14 = vmul.f32 %v3523_v33, %v1690_v50 }
 0x170   : > { %v1658_v51 = vmul.f32 %v3502_v63, %v1523_v30  ;;  %vm1558_vm8 = vcmp.gt.f32.partialorder %v1494_v45, 0.0  ;;  %2182 = vst.msk [vmem:[%s3135_s8 + $0xe4] sm:$0xf] %vm2124_vm4, %v2557_v49  ;;  %v1629_v52 = vmul.f32 %v3502_v63, %v1494_v45  ;;  %v1526_v10 = vadd.f32 %v3487_v38, %v1455_v22 }
 0x171   : > { %v1866_v16 = vadd.f32 %v3549_v29, %v1795_v19  ;;  %2155 = vst.msk [vmem:[%s3135_s8 + $0x78] sm:$0xf] %vm2124_vm4, %v2530_v13  ;;  %v1832_v41 = vadd.f32 %v3549_v29, %v1761_v14  ;;  %v1453_v56 = vmul.f32 %v3471_v0, %v1382_v20  ;;  %v1492_v3 = vadd.f32 %v3487_v38, %v1421_v62 }
 0x172   : > { %v1722_v55 = vsel %vm1587_vm7, %v1523_v30, %v1658_v51  ;;  %v1693_v32 = vsel %vm1558_vm8, %v1494_v45, %v1629_v52  ;;  %vm1590_vm2 = vcmp.gt.f32.partialorder %v1526_v10, 0.0  ;;  %v1661_v47 = vmul.f32 %v3502_v63, %v1526_v10 }
 0x173   : > { %v2562_v57 = vpack.c.bf16 %v1866_v16, %v1866_v16  ;;  %v1793_v61 = vmul.f32 %v3523_v33, %v1722_v55  ;;  %v2528_v31 = vpack.c.bf16 %v1832_v41, %v1832_v41  ;;  %v1764_v34 = vmul.f32 %v3523_v33, %v1693_v32 }
 0x174   : > { %v1524_v5 = vadd.f32 %v3487_v38, %v1453_v56  ;;  %v1725_v6 = vsel %vm1590_vm2, %v1526_v10, %v1661_v47  ;;  %vm1556_vm9 = vcmp.gt.f32.partialorder %v1492_v3, 0.0  ;;  %v1627_v48 = vmul.f32 %v3502_v63, %v1492_v3 }
 0x175   : > { %2187 = vst.msk [vmem:[%s3135_s8 + $0xf8] sm:$0xf] %vm2124_vm4, %v2562_v57  ;;  %v1864_v4 = vadd.f32 %v3549_v29, %v1793_v61  ;;  %2153 = vst.msk [vmem:[%s3135_s8 + $0x70] sm:$0xf] %vm2124_vm4, %v2528_v31  ;;  %v1835_v0 = vadd.f32 %v3549_v29, %v1764_v34  ;;  %v1796_v36 = vmul.f32 %v3523_v33, %v1725_v6 }
 0x176   : > { %vm1588_vm10 = vcmp.gt.f32.partialorder %v1524_v5, 0.0  ;;  %v1659_v35 = vmul.f32 %v3502_v63, %v1524_v5  ;;  %v1691_v38 = vsel %vm1556_vm9, %v1492_v3, %v1627_v48 }
 0x177   : > { %v2560_v58 = vpack.c.bf16 %v1864_v4, %v1864_v4  ;;  %v2531_v59 = vpack.c.bf16 %v1835_v0, %v1835_v0  ;;  %v1867_v8 = vadd.f32 %v3549_v29, %v1796_v36  ;;  %v1762_v7 = vmul.f32 %v3523_v33, %v1691_v38 }
 0x178   : > { %v1723_v37 = vsel %vm1588_vm10, %v1524_v5, %v1659_v35 }
 0x179   : > { %2185 = vst.msk [vmem:[%s3135_s8 + $0xf0] sm:$0xf] %vm2124_vm4, %v2560_v58  ;;  %2156 = vst.msk [vmem:[%s3135_s8 + $0x7c] sm:$0xf] %vm2124_vm4, %v2531_v59  ;;  %v1794_v25 = vmul.f32 %v3523_v33, %v1723_v37  ;;  %v2563_v15 = vpack.c.bf16 %v1867_v8, %v1867_v8  ;;  %v1833_v17 = vadd.f32 %v3549_v29, %v1762_v7 }
 0x17b   : > { %v1865_v18 = vadd.f32 %v3549_v29, %v1794_v25  ;;  %2188 = vst.msk [vmem:[%s3135_s8 + $0xfc] sm:$0xf] %vm2124_vm4, %v2563_v15  ;;  %v2529_v63 = vpack.c.bf16 %v1833_v17, %v1833_v17 }
 0x17d   : > { %v2561_v1 = vpack.c.bf16 %v1865_v18, %v1865_v18  ;;  %2154 = vst.msk [vmem:[%s3135_s8 + $0x74] sm:$0xf] %vm2124_vm4, %v2529_v63 }
 0x17f   : > { %2186 = vst.msk [vmem:[%s3135_s8 + $0xf4] sm:$0xf] %vm2124_vm4, %v2561_v1 }
 0x180 PF: > { %s17_s26 = sadd.s32 1, %s2757_s26   ;;  %s3771_s24 = smov %s2753_s25 }
 0x181   : > { %p14_p5 = scmp.ge.s32.totalorder %s17_s26, 51   ;;  %s3772_s25 = smov %s3774_s27 }
 0x183   :  { %16 = sbr.rel (!%p14_p5) target bundleno = 2 (0x2), region = 104 }

</bundles_post_ra>
